<compile_context>
chip_gen: v7x
topology: tpu7x:2x2x1
jax: 0.10.0
libtpu: 0.0.40
codegen_flags: <defaults>
</compile_context>

<pallas_src>
import math
import functools

import jax
import jax.numpy as jnp
from jax import lax
from jax.experimental import pallas as pl
from jax.experimental.pallas import tpu as pltpu

# ------------------------- small synthetic BERT config -------------------------
VOCAB = 256           # tokenizer.vocab_size (synthetic; real: 21128)
HIDDEN = 128          # encoder hidden size (synthetic; real: 768) -- lane dense
N_LAYERS = 2
N_HEADS = 2
HEAD_DIM = HIDDEN // N_HEADS
INTERMEDIATE = 4 * HIDDEN
MAX_POS = 16
LN_EPS = 1e-12


def _row_tile(m, cap=256):
    """Largest row tile <= cap that divides m (multiple of 8 when sub-tiling)."""
    if m <= cap:
        return m
    for t in range(cap, 7, -1):
        if m % t == 0 and t % 8 == 0:
            return t
    return m


def _mxu(x, w):
    """bf16-fed MXU matmul with f32 accumulation."""
    return jnp.dot(x.astype(jnp.bfloat16), w.astype(jnp.bfloat16),
                   preferred_element_type=jnp.float32)


# ------------------------------- Pallas kernels --------------------------------


def _linear_kernel(x_ref, w_ref, b_ref, o_ref):
    # [TM,K] @ [K,N] + [1,N]
    o_ref[...] = _mxu(x_ref[...], w_ref[...]) + b_ref[...]


def _linear_gelu_kernel(x_ref, w_ref, b_ref, o_ref):
    y = _mxu(x_ref[...], w_ref[...]) + b_ref[...]
    # TODO(synk): BERT uses exact erf-GELU; tanh-approx kept (EUP-friendly, <1e-3 diff)
    o_ref[...] = jax.nn.gelu(y, approximate=True)


def _linear_res_ln_kernel(x_ref, w_ref, b_ref, res_ref, g_ref, beta_ref, o_ref, *, eps):
    # fused: (x @ W + b + residual) -> LayerNorm
    y = _mxu(x_ref[...], w_ref[...]) + b_ref[...] + res_ref[...]
    mu = jnp.mean(y, axis=-1, keepdims=True)
    var = jnp.mean((y - mu) * (y - mu), axis=-1, keepdims=True)
    o_ref[...] = (y - mu) * lax.rsqrt(var + eps) * g_ref[...] + beta_ref[...]


def _emb_ln_kernel(we_ref, pt_ref, g_ref, b_ref, o_ref, *, eps):
    # fused: word_emb + (pos_emb + type_emb) -> LayerNorm
    x = we_ref[...] + pt_ref[...]
    mu = jnp.mean(x, axis=-1, keepdims=True)
    var = jnp.mean((x - mu) * (x - mu), axis=-1, keepdims=True)
    o_ref[...] = (x - mu) * lax.rsqrt(var + eps) * g_ref[...] + b_ref[...]


def _attention_kernel(qkv_ref, m_ref, o_ref, *, scale, n_heads, head_dim, hidden):
    # One batch element: qkv block is [S, 3H]; heads sliced statically in-kernel.
    qkv = qkv_ref[...]
    q = qkv[:, 0:hidden]
    k = qkv[:, hidden:2 * hidden]
    v = qkv[:, 2 * hidden:3 * hidden]
    mask = m_ref[0]                      # [1, S] additive (0 / -10000)
    outs = []
    for h in range(n_heads):             # static unrolled loop over heads
        lo, hi = h * head_dim, (h + 1) * head_dim
        qh, kh, vh = q[:, lo:hi], k[:, lo:hi], v[:, lo:hi]
        s = lax.dot_general(
            qh.astype(jnp.bfloat16), kh.astype(jnp.bfloat16),
            dimension_numbers=(((1,), (1,)), ((), ())),
            preferred_element_type=jnp.float32,
        ) * scale                         # [S, S]
        s = s + mask
        mx = jnp.max(s, axis=-1, keepdims=True)
        p = jnp.exp(s - mx)
        p = p * pl.reciprocal(jnp.sum(p, axis=-1, keepdims=True), approx=True)
        outs.append(jnp.dot(p.astype(jnp.bfloat16), vh.astype(jnp.bfloat16),
                            preferred_element_type=jnp.float32))
    o_ref[...] = jnp.concatenate(outs, axis=-1)   # [S, H], single lane-dense store


def _classify_softmax_kernel(x_ref, w_ref, b_ref, o_ref):
    logits = _mxu(x_ref[...], w_ref[...]) + b_ref[...]
    m = jnp.max(logits, axis=-1, keepdims=True)
    e = jnp.exp(logits - m)
    o_ref[...] = e * pl.reciprocal(jnp.sum(e, axis=-1, keepdims=True), approx=True)


def _classify_xent_kernel(x_ref, w_ref, b_ref, y_ref, loss_ref, acc_ref, *, total_rows):
    # fused classifier matmul + cross-entropy; logits never materialize in HBM.
    i = pl.program_id(0)

    @pl.when(i == 0)
    def _():
        acc_ref[...] = jnp.zeros_like(acc_ref)

    logits = _mxu(x_ref[...], w_ref[...]) + b_ref[...]          # [TM, V] f32
    m = jnp.max(logits, axis=-1, keepdims=True)
    lse = jnp.log(jnp.sum(jnp.exp(logits - m), axis=-1, keepdims=True)) + m
    ids = lax.broadcasted_iota(jnp.int32, logits.shape, 1)
    onehot = (ids == y_ref[...]).astype(jnp.float32)            # y_ref: [TM, 1]
    tgt = jnp.sum(logits * onehot, axis=-1, keepdims=True)
    acc_ref[...] = acc_ref[...] + jnp.sum(lse - tgt)

    @pl.when(i == pl.num_programs(0) - 1)
    def _():
        loss_ref[...] = acc_ref[...] / total_rows


# ------------------------------ Pallas wrappers ---------------------------------


def pallas_linear(x, w, b, *, gelu=False):
    M, K = x.shape
    N = w.shape[1]
    TM = _row_tile(M)
    kern = _linear_gelu_kernel if gelu else _linear_kernel
    return pl.pallas_call(
        kern,
        out_shape=jax.ShapeDtypeStruct((M, N), jnp.float32),
        grid=(M // TM,),
        in_specs=[
            pl.BlockSpec((TM, K), lambda i: (i, 0)),
            pl.BlockSpec((K, N), lambda i: (0, 0)),
            pl.BlockSpec((1, N), lambda i: (0, 0)),
        ],
        out_specs=pl.BlockSpec((TM, N), lambda i: (i, 0)),
        compiler_params=pltpu.CompilerParams(dimension_semantics=("parallel",)),
    )(x, w, b.reshape(1, N))


def pallas_linear_res_ln(x, w, b, res, gamma, beta, eps=LN_EPS):
    M, K = x.shape
    N = w.shape[1]
    TM = _row_tile(M)
    return pl.pallas_call(
        functools.partial(_linear_res_ln_kernel, eps=eps),
        out_shape=jax.ShapeDtypeStruct((M, N), jnp.float32),
        grid=(M // TM,),
        in_specs=[
            pl.BlockSpec((TM, K), lambda i: (i, 0)),
            pl.BlockSpec((K, N), lambda i: (0, 0)),
            pl.BlockSpec((1, N), lambda i: (0, 0)),
            pl.BlockSpec((TM, N), lambda i: (i, 0)),
            pl.BlockSpec((1, N), lambda i: (0, 0)),
            pl.BlockSpec((1, N), lambda i: (0, 0)),
        ],
        out_specs=pl.BlockSpec((TM, N), lambda i: (i, 0)),
        compiler_params=pltpu.CompilerParams(dimension_semantics=("parallel",)),
    )(x, w, b.reshape(1, N), res, gamma.reshape(1, N), beta.reshape(1, N))


def pallas_emb_ln(we, pos_type, gamma, beta, B, S, eps=LN_EPS):
    M, H = we.shape
    return pl.pallas_call(
        functools.partial(_emb_ln_kernel, eps=eps),
        out_shape=jax.ShapeDtypeStruct((M, H), jnp.float32),
        grid=(B,),
        in_specs=[
            pl.BlockSpec((S, H), lambda b: (b, 0)),
            pl.BlockSpec((S, H), lambda b: (0, 0)),
            pl.BlockSpec((1, H), lambda b: (0, 0)),
            pl.BlockSpec((1, H), lambda b: (0, 0)),
        ],
        out_specs=pl.BlockSpec((S, H), lambda b: (b, 0)),
        compiler_params=pltpu.CompilerParams(dimension_semantics=("parallel",)),
    )(we, pos_type, gamma.reshape(1, H), beta.reshape(1, H))


def pallas_attention(qkv, add_mask, B, S):
    # qkv: [B*S, 3H]; add_mask: [B, 1, S] additive; returns context [B*S, H]
    H = HIDDEN
    scale = 1.0 / math.sqrt(HEAD_DIM)
    return pl.pallas_call(
        functools.partial(_attention_kernel, scale=scale,
                          n_heads=N_HEADS, head_dim=HEAD_DIM, hidden=H),
        out_shape=jax.ShapeDtypeStruct((B * S, H), jnp.float32),
        grid=(B,),
        in_specs=[
            pl.BlockSpec((S, 3 * H), lambda b: (b, 0)),
            pl.BlockSpec((1, 1, S), lambda b: (b, 0, 0)),
        ],
        out_specs=pl.BlockSpec((S, H), lambda b: (b, 0)),
        compiler_params=pltpu.CompilerParams(dimension_semantics=("parallel",)),
    )(qkv, add_mask)


def pallas_classify_softmax(x, w, b):
    M, H = x.shape
    V = w.shape[1]
    TM = _row_tile(M)
    return pl.pallas_call(
        _classify_softmax_kernel,
        out_shape=jax.ShapeDtypeStruct((M, V), jnp.float32),
        grid=(M // TM,),
        in_specs=[
            pl.BlockSpec((TM, H), lambda i: (i, 0)),
            pl.BlockSpec((H, V), lambda i: (0, 0)),
            pl.BlockSpec((1, V), lambda i: (0, 0)),
        ],
        out_specs=pl.BlockSpec((TM, V), lambda i: (i, 0)),
        compiler_params=pltpu.CompilerParams(
            dimension_semantics=("parallel",),
            vmem_limit_bytes=32 * 1024 * 1024),
    )(x, w, b.reshape(1, V))


def pallas_classify_xent(x, w, b, y_flat):
    M, H = x.shape
    V = w.shape[1]
    TM = _row_tile(M)
    loss = pl.pallas_call(
        functools.partial(_classify_xent_kernel, total_rows=M),
        out_shape=jax.ShapeDtypeStruct((1, 1), jnp.float32),
        grid=(M // TM,),
        in_specs=[
            pl.BlockSpec((TM, H), lambda i: (i, 0)),
            pl.BlockSpec((H, V), lambda i: (0, 0)),
            pl.BlockSpec((1, V), lambda i: (0, 0)),
            pl.BlockSpec((TM, 1), lambda i: (i, 0)),
        ],
        out_specs=pl.BlockSpec((1, 1), lambda i: (0, 0)),
        scratch_shapes=[pltpu.VMEM((1, 1), jnp.float32)],
        compiler_params=pltpu.CompilerParams(
            dimension_semantics=("arbitrary",),
            vmem_limit_bytes=32 * 1024 * 1024),
    )(x, w, b.reshape(1, V), y_flat.reshape(M, 1).astype(jnp.int32))
    return loss[0, 0]


# ------------------------------ model (glue + kernels) ---------------------------


def bert_layer(h, add_mask, p, B, S):
    # h: [M, H]
    qkv = pallas_linear(h, p["w_qkv"], p["b_qkv"])                  # fused QKV
    ctx = pallas_attention(qkv, add_mask, B, S)                     # [M, H]
    h1 = pallas_linear_res_ln(ctx, p["wo"], p["bo"], h, p["ln1_g"], p["ln1_b"])
    ff = pallas_linear(h1, p["w1"], p["b1"], gelu=True)             # [M, 4H]
    h2 = pallas_linear_res_ln(ff, p["w2"], p["b2"], h1, p["ln2_g"], p["ln2_b"])
    return h2


def bert_encoder(params, input_ids, attention_mask):
    B, S = input_ids.shape
    M = B * S
    # embedding gathers stay in plain JAX (glue); sums + LN fused in the kernel
    word = params["word_emb"][input_ids].reshape(M, HIDDEN)
    pos_type = params["pos_emb"][:S] + params["type_emb"][0][None, :]   # [S, H]
    h = pallas_emb_ln(word, pos_type, params["emb_ln_g"], params["emb_ln_b"], B, S)
    # dropout(0.1) is identity in eval mode
    add_mask = ((1.0 - attention_mask.astype(jnp.float32)) * -10000.0).reshape(B, 1, S)
    for p in params["layers"]:
        h = bert_layer(h, add_mask, p, B, S)
    return h.reshape(B, S, HIDDEN)


def language_model_forward(params, x, attention_mask=None, y=None):
    """Mirrors LanguageModel.forward."""
    B, S = x.shape
    if attention_mask is None:
        attention_mask = jnp.ones((B, S), dtype=jnp.int32)
    seq_out = bert_encoder(params, x, attention_mask)               # encoder(...)[0]
    x2 = seq_out.reshape(B * S, HIDDEN)
    if y is not None:
        # fused classifier + cross-entropy (mean over all B*S positions)
        return pallas_classify_xent(x2, params["wc"], params["bc"], y.reshape(-1))
    probs = pallas_classify_softmax(x2, params["wc"], params["bc"])
    return probs.reshape(B, S, VOCAB)


# ----------------------------- deterministic init --------------------------------


def init_params(key):
    keys = iter(jax.random.split(key, 64))

    def nrm(shape, scale=0.02):
        return scale * jax.random.normal(next(keys), shape, dtype=jnp.float32)

    params = {
        "word_emb": nrm((VOCAB, HIDDEN)),
        "pos_emb": nrm((MAX_POS, HIDDEN)),
        "type_emb": nrm((2, HIDDEN)),
        "emb_ln_g": jnp.ones((HIDDEN,), jnp.float32),
        "emb_ln_b": jnp.zeros((HIDDEN,), jnp.float32),
        "wc": nrm((HIDDEN, VOCAB)),
        "bc": jnp.zeros((VOCAB,), jnp.float32),
        "layers": [],
    }
    for _ in range(N_LAYERS):
        params["layers"].append(
            {
                "w_qkv": nrm((HIDDEN, 3 * HIDDEN)),
                "b_qkv": jnp.zeros((3 * HIDDEN,), jnp.float32),
                "wo": nrm((HIDDEN, HIDDEN)), "bo": jnp.zeros((HIDDEN,), jnp.float32),
                "ln1_g": jnp.ones((HIDDEN,), jnp.float32),
                "ln1_b": jnp.zeros((HIDDEN,), jnp.float32),
                "w1": nrm((HIDDEN, INTERMEDIATE)),
                "b1": jnp.zeros((INTERMEDIATE,), jnp.float32),
                "w2": nrm((INTERMEDIATE, HIDDEN)),
                "b2": jnp.zeros((HIDDEN,), jnp.float32),
                "ln2_g": jnp.ones((HIDDEN,), jnp.float32),
                "ln2_b": jnp.zeros((HIDDEN,), jnp.float32),
            }
        )
    return params


# ------------------------------------ main ---------------------------------------

if __name__ == "__main__":
    B, S = 2, 8
    root = jax.random.PRNGKey(0)
    k_params, k_ids, k_y = jax.random.split(root, 3)

    params = init_params(k_params)
    input_ids = jax.random.randint(k_ids, (B, S), 0, VOCAB, dtype=jnp.int32)
    attention_mask = jnp.ones((B, S), dtype=jnp.int32)
    y = jax.random.randint(k_y, (B, S), 0, VOCAB, dtype=jnp.int32)

    infer_fn = jax.jit(lambda p, ids, am: language_model_forward(p, ids, am, y=None))
    loss_fn = jax.jit(lambda p, ids, am, yy: language_model_forward(p, ids, am, y=yy))

    # inference branch: softmax probabilities over vocab
    probs = jax.block_until_ready(infer_fn(params, input_ids, attention_mask))
    assert probs.shape == (B, S, VOCAB)
    assert bool(jnp.all(jnp.isfinite(probs)))

    # training branch: mean cross-entropy loss
    loss = jax.block_until_ready(loss_fn(params, input_ids, attention_mask, y))
    assert loss.shape == ()
    assert bool(jnp.isfinite(loss))

    print("KERNEL_OK")
</pallas_src>

<mosaic_0001>
module attributes {stable_mosaic.version = 11 : i64} {
  func.func @_emb_ln_kernel(%arg0: i32, %arg1: memref<8x128xf32, #tpu.memory_space<vmem>>, %arg2: memref<8x128xf32, #tpu.memory_space<vmem>>, %arg3: memref<1x128xf32, #tpu.memory_space<vmem>>, %arg4: memref<1x128xf32, #tpu.memory_space<vmem>>, %arg5: memref<8x128xf32, #tpu.memory_space<vmem>>) attributes {dimension_semantics = [#tpu.dimension_semantics<parallel>], iteration_bounds = array<i64: 2>, scalar_prefetch = 0 : i64, scratch_operands = 0 : i64, tpu.core_type = #tpu.core_type<tc>, window_params = [{transform_indices = @transform_0, window_bounds = array<i64: 8, 128>}, {pipeline_mode = #tpu.pipeline_mode<synchronous>, transform_indices = @transform_1, window_bounds = array<i64: 8, 128>}, {pipeline_mode = #tpu.pipeline_mode<synchronous>, transform_indices = @transform_2, window_bounds = array<i64: 1, 128>}, {pipeline_mode = #tpu.pipeline_mode<synchronous>, transform_indices = @transform_3, window_bounds = array<i64: 1, 128>}, {transform_indices = @transform_4, window_bounds = array<i64: 8, 128>}]} {
    %c0 = arith.constant 0 : index
    %c0_0 = arith.constant 0 : index
    %0 = vector.load %arg1[%c0, %c0_0] : memref<8x128xf32, #tpu.memory_space<vmem>>, vector<8x128xf32>
    %c0_1 = arith.constant 0 : index
    %c0_2 = arith.constant 0 : index
    %1 = vector.load %arg2[%c0_1, %c0_2] : memref<8x128xf32, #tpu.memory_space<vmem>>, vector<8x128xf32>
    %2 = arith.addf %0, %1 : vector<8x128xf32>
    %cst = arith.constant dense<0.000000e+00> : vector<8xf32>
    %3 = vector.multi_reduction <add>, %2, %cst [1] : vector<8x128xf32> to vector<8xf32>
    %4 = vector.shape_cast %3 : vector<8xf32> to vector<8x1xf32>
    %cst_3 = arith.constant 1.280000e+02 : f32
    %5 = vector.broadcast %cst_3 : f32 to vector<8x1xf32>
    %6 = arith.divf %4, %5 : vector<8x1xf32>
    %7 = vector.broadcast %6 : vector<8x1xf32> to vector<8x128xf32>
    %8 = arith.subf %2, %7 : vector<8x128xf32>
    %9 = vector.broadcast %6 : vector<8x1xf32> to vector<8x128xf32>
    %10 = arith.subf %2, %9 : vector<8x128xf32>
    %11 = arith.mulf %8, %10 : vector<8x128xf32>
    %cst_4 = arith.constant dense<0.000000e+00> : vector<8xf32>
    %12 = vector.multi_reduction <add>, %11, %cst_4 [1] : vector<8x128xf32> to vector<8xf32>
    %13 = vector.shape_cast %12 : vector<8xf32> to vector<8x1xf32>
    %cst_5 = arith.constant 1.280000e+02 : f32
    %14 = vector.broadcast %cst_5 : f32 to vector<8x1xf32>
    %15 = arith.divf %13, %14 : vector<8x1xf32>
    %16 = vector.broadcast %6 : vector<8x1xf32> to vector<8x128xf32>
    %17 = arith.subf %2, %16 : vector<8x128xf32>
    %cst_6 = arith.constant 9.99999996E-13 : f32
    %18 = vector.broadcast %cst_6 : f32 to vector<8x1xf32>
    %19 = arith.addf %15, %18 : vector<8x1xf32>
    %20 = math.rsqrt %19 : vector<8x1xf32>
    %21 = vector.broadcast %20 : vector<8x1xf32> to vector<8x128xf32>
    %22 = arith.mulf %17, %21 : vector<8x128xf32>
    %c0_7 = arith.constant 0 : index
    %c0_8 = arith.constant 0 : index
    %23 = vector.load %arg3[%c0_7, %c0_8] : memref<1x128xf32, #tpu.memory_space<vmem>>, vector<1x128xf32>
    %24 = vector.broadcast %23 : vector<1x128xf32> to vector<8x128xf32>
    %25 = arith.mulf %22, %24 : vector<8x128xf32>
    %c0_9 = arith.constant 0 : index
    %c0_10 = arith.constant 0 : index
    %26 = vector.load %arg4[%c0_9, %c0_10] : memref<1x128xf32, #tpu.memory_space<vmem>>, vector<1x128xf32>
    %27 = vector.broadcast %26 : vector<1x128xf32> to vector<8x128xf32>
    %28 = arith.addf %25, %27 : vector<8x128xf32>
    %c0_11 = arith.constant 0 : index
    %c0_12 = arith.constant 0 : index
    %29 = vector.load %arg5[%c0_11, %c0_12] : memref<8x128xf32, #tpu.memory_space<vmem>>, vector<8x128xf32>
    tpu.vector_store %arg5[%c0_11, %c0_12], %28 {strides = array<i32>} : memref<8x128xf32, #tpu.memory_space<vmem>>, vector<8x128xf32>,
    return
  }
  func.func @transform_0(%arg0: i32) -> (i32, i32) {
    %c0_i32 = arith.constant 0 : i32
    %c0_i32_0 = arith.constant 0 : i32
    return %arg0, %c0_i32 : i32, i32
  }
  func.func @transform_1(%arg0: i32) -> (i32, i32) {
    %c0_i32 = arith.constant 0 : i32
    %c0_i32_0 = arith.constant 0 : i32
    %c0_i32_1 = arith.constant 0 : i32
    return %c0_i32, %c0_i32_0 : i32, i32
  }
  func.func @transform_2(%arg0: i32) -> (i32, i32) {
    %c0_i32 = arith.constant 0 : i32
    %c0_i32_0 = arith.constant 0 : i32
    %c0_i32_1 = arith.constant 0 : i32
    return %c0_i32, %c0_i32_0 : i32, i32
  }
  func.func @transform_3(%arg0: i32) -> (i32, i32) {
    %c0_i32 = arith.constant 0 : i32
    %c0_i32_0 = arith.constant 0 : i32
    %c0_i32_1 = arith.constant 0 : i32
    return %c0_i32, %c0_i32_0 : i32, i32
  }
  func.func @transform_4(%arg0: i32) -> (i32, i32) {
    %c0_i32 = arith.constant 0 : i32
    %c0_i32_0 = arith.constant 0 : i32
    return %arg0, %c0_i32 : i32, i32
  }
}

module attributes {stable_mosaic.version = 11 : i64} {
  func.func @_attention_kernel(%arg0: i32, %arg1: memref<8x384xf32, #tpu.memory_space<vmem>>, %arg2: memref<1x1x8xf32, #tpu.memory_space<vmem>>, %arg3: memref<8x128xf32, #tpu.memory_space<vmem>>) attributes {dimension_semantics = [#tpu.dimension_semantics<parallel>], iteration_bounds = array<i64: 2>, scalar_prefetch = 0 : i64, scratch_operands = 0 : i64, tpu.core_type = #tpu.core_type<tc>, window_params = [{transform_indices = @transform_0, window_bounds = array<i64: 8, 384>}, {transform_indices = @transform_1, window_bounds = array<i64: 1, 1, 8>}, {transform_indices = @transform_2, window_bounds = array<i64: 8, 128>}]} {
    %c0 = arith.constant 0 : index
    %c0_0 = arith.constant 0 : index
    %0 = vector.load %arg1[%c0, %c0_0] : memref<8x384xf32, #tpu.memory_space<vmem>>, vector<8x384xf32>
    %1 = vector.extract_strided_slice %0 {offsets = [0, 0], sizes = [8, 128], strides = [1, 1]} : vector<8x384xf32> to vector<8x128xf32>
    %2 = vector.extract_strided_slice %0 {offsets = [0, 128], sizes = [8, 128], strides = [1, 1]} : vector<8x384xf32> to vector<8x128xf32>
    %3 = vector.extract_strided_slice %0 {offsets = [0, 256], sizes = [8, 128], strides = [1, 1]} : vector<8x384xf32> to vector<8x128xf32>
    %c0_1 = arith.constant 0 : index
    %c0_2 = arith.constant 0 : index
    %c0_3 = arith.constant 0 : index
    %4 = vector.load %arg2[%c0_1, %c0_2, %c0_3] : memref<1x1x8xf32, #tpu.memory_space<vmem>>, vector<1x1x8xf32>
    %5 = vector.shape_cast %4 : vector<1x1x8xf32> to vector<1x8xf32>
    %6 = vector.extract_strided_slice %1 {offsets = [0, 0], sizes = [8, 64], strides = [1, 1]} : vector<8x128xf32> to vector<8x64xf32>
    %7 = vector.extract_strided_slice %2 {offsets = [0, 0], sizes = [8, 64], strides = [1, 1]} : vector<8x128xf32> to vector<8x64xf32>
    %8 = vector.extract_strided_slice %3 {offsets = [0, 0], sizes = [8, 64], strides = [1, 1]} : vector<8x128xf32> to vector<8x64xf32>
    %9 = arith.truncf %6 : vector<8x64xf32> to vector<8x64xbf16>
    %10 = arith.truncf %7 : vector<8x64xf32> to vector<8x64xbf16>
    %cst = arith.constant dense<0.000000e+00> : vector<8x8xf32>
    %11 = tpu.matmul %9, %10, %cst {dimension_numbers = #tpu.dot_dimension_numbers<[1], [1], [0], [0], [0, 0, 1, 0], [], []>} : vector<8x64xbf16>, vector<8x64xbf16>, vector<8x8xf32> -> vector<8x8xf32>
    %cst_4 = arith.constant 1.250000e-01 : f32
    %12 = vector.broadcast %cst_4 : f32 to vector<8x8xf32>
    %13 = arith.mulf %11, %12 : vector<8x8xf32>
    %14 = vector.broadcast %5 : vector<1x8xf32> to vector<8x8xf32>
    %15 = arith.addf %13, %14 : vector<8x8xf32>
    %cst_5 = arith.constant dense<0xFF800000> : vector<8xf32>
    %16 = vector.multi_reduction <maximumf>, %15, %cst_5 [1] : vector<8x8xf32> to vector<8xf32>
    %17 = vector.shape_cast %16 : vector<8xf32> to vector<8x1xf32>
    %18 = vector.broadcast %17 : vector<8x1xf32> to vector<8x8xf32>
    %19 = arith.subf %15, %18 : vector<8x8xf32>
    %20 = math.exp %19 : vector<8x8xf32>
    %cst_6 = arith.constant dense<0.000000e+00> : vector<8xf32>
    %21 = vector.multi_reduction <add>, %20, %cst_6 [1] : vector<8x8xf32> to vector<8xf32>
    %22 = vector.shape_cast %21 : vector<8xf32> to vector<8x1xf32>
    %23 = tpu.reciprocal %22 {approx = true} : vector<8x1xf32> -> vector<8x1xf32>
    %24 = vector.broadcast %23 : vector<8x1xf32> to vector<8x8xf32>
    %25 = arith.mulf %20, %24 : vector<8x8xf32>
    %26 = arith.truncf %25 : vector<8x8xf32> to vector<8x8xbf16>
    %27 = arith.truncf %8 : vector<8x64xf32> to vector<8x64xbf16>
    %cst_7 = arith.constant dense<0.000000e+00> : vector<8x64xf32>
    %28 = tpu.matmul %26, %27, %cst_7 {dimension_numbers = #tpu.dot_dimension_numbers<[1], [0], [0], [1], [0, 0, 1, 1], [], []>} : vector<8x8xbf16>, vector<8x64xbf16>, vector<8x64xf32> -> vector<8x64xf32>
    %29 = vector.extract_strided_slice %1 {offsets = [0, 64], sizes = [8, 64], strides = [1, 1]} : vector<8x128xf32> to vector<8x64xf32>
    %30 = vector.extract_strided_slice %2 {offsets = [0, 64], sizes = [8, 64], strides = [1, 1]} : vector<8x128xf32> to vector<8x64xf32>
    %31 = vector.extract_strided_slice %3 {offsets = [0, 64], sizes = [8, 64], strides = [1, 1]} : vector<8x128xf32> to vector<8x64xf32>
    %32 = arith.truncf %29 : vector<8x64xf32> to vector<8x64xbf16>
    %33 = arith.truncf %30 : vector<8x64xf32> to vector<8x64xbf16>
    %cst_8 = arith.constant dense<0.000000e+00> : vector<8x8xf32>
    %34 = tpu.matmul %32, %33, %cst_8 {dimension_numbers = #tpu.dot_dimension_numbers<[1], [1], [0], [0], [0, 0, 1, 0], [], []>} : vector<8x64xbf16>, vector<8x64xbf16>, vector<8x8xf32> -> vector<8x8xf32>
    %cst_9 = arith.constant 1.250000e-01 : f32
    %35 = vector.broadcast %cst_9 : f32 to vector<8x8xf32>
    %36 = arith.mulf %34, %35 : vector<8x8xf32>
    %37 = vector.broadcast %5 : vector<1x8xf32> to vector<8x8xf32>
    %38 = arith.addf %36, %37 : vector<8x8xf32>
    %cst_10 = arith.constant dense<0xFF800000> : vector<8xf32>
    %39 = vector.multi_reduction <maximumf>, %38, %cst_10 [1] : vector<8x8xf32> to vector<8xf32>
    %40 = vector.shape_cast %39 : vector<8xf32> to vector<8x1xf32>
    %41 = vector.broadcast %40 : vector<8x1xf32> to vector<8x8xf32>
    %42 = arith.subf %38, %41 : vector<8x8xf32>
    %43 = math.exp %42 : vector<8x8xf32>
    %cst_11 = arith.constant dense<0.000000e+00> : vector<8xf32>
    %44 = vector.multi_reduction <add>, %43, %cst_11 [1] : vector<8x8xf32> to vector<8xf32>
    %45 = vector.shape_cast %44 : vector<8xf32> to vector<8x1xf32>
    %46 = tpu.reciprocal %45 {approx = true} : vector<8x1xf32> -> vector<8x1xf32>
    %47 = vector.broadcast %46 : vector<8x1xf32> to vector<8x8xf32>
    %48 = arith.mulf %43, %47 : vector<8x8xf32>
    %49 = arith.truncf %48 : vector<8x8xf32> to vector<8x8xbf16>
    %50 = arith.truncf %31 : vector<8x64xf32> to vector<8x64xbf16>
    %cst_12 = arith.constant dense<0.000000e+00> : vector<8x64xf32>
    %51 = tpu.matmul %49, %50, %cst_12 {dimension_numbers = #tpu.dot_dimension_numbers<[1], [0], [0], [1], [0, 0, 1, 1], [], []>} : vector<8x8xbf16>, vector<8x64xbf16>, vector<8x64xf32> -> vector<8x64xf32>
    %52 = tpu.concatenate %28, %51 in 1 : vector<8x64xf32>, vector<8x64xf32> -> vector<8x128xf32>
    %c0_13 = arith.constant 0 : index
    %c0_14 = arith.constant 0 : index
    %53 = vector.load %arg3[%c0_13, %c0_14] : memref<8x128xf32, #tpu.memory_space<vmem>>, vector<8x128xf32>
    tpu.vector_store %arg3[%c0_13, %c0_14], %52 {strides = array<i32>} : memref<8x128xf32, #tpu.memory_space<vmem>>, vector<8x128xf32>,
    return
  }
  func.func @transform_0(%arg0: i32) -> (i32, i32) {
    %c0_i32 = arith.constant 0 : i32
    %c0_i32_0 = arith.constant 0 : i32
    return %arg0, %c0_i32 : i32, i32
  }
  func.func @transform_1(%arg0: i32) -> (i32, i32, i32) {
    %c0_i32 = arith.constant 0 : i32
    %c0_i32_0 = arith.constant 0 : i32
    %c0_i32_1 = arith.constant 0 : i32
    return %arg0, %c0_i32, %c0_i32_0 : i32, i32, i32
  }
  func.func @transform_2(%arg0: i32) -> (i32, i32) {
    %c0_i32 = arith.constant 0 : i32
    %c0_i32_0 = arith.constant 0 : i32
    return %arg0, %c0_i32 : i32, i32
  }
}

module attributes {stable_mosaic.version = 11 : i64} {
  func.func @_linear_kernel(%arg0: i32, %arg1: memref<16x128xf32, #tpu.memory_space<vmem>>, %arg2: memref<128x384xf32, #tpu.memory_space<vmem>>, %arg3: memref<1x384xf32, #tpu.memory_space<vmem>>, %arg4: memref<16x384xf32, #tpu.memory_space<vmem>>) attributes {dimension_semantics = [#tpu.dimension_semantics<parallel>], iteration_bounds = array<i64: 1>, scalar_prefetch = 0 : i64, scratch_operands = 0 : i64, tpu.core_type = #tpu.core_type<tc>, window_params = [{transform_indices = @transform_0, window_bounds = array<i64: 16, 128>}, {pipeline_mode = #tpu.pipeline_mode<synchronous>, transform_indices = @transform_1, window_bounds = array<i64: 128, 384>}, {pipeline_mode = #tpu.pipeline_mode<synchronous>, transform_indices = @transform_2, window_bounds = array<i64: 1, 384>}, {transform_indices = @transform_3, window_bounds = array<i64: 16, 384>}]} {
    %c0 = arith.constant 0 : index
    %c0_0 = arith.constant 0 : index
    %0 = vector.load %arg1[%c0, %c0_0] : memref<16x128xf32, #tpu.memory_space<vmem>>, vector<16x128xf32>
    %c0_1 = arith.constant 0 : index
    %c0_2 = arith.constant 0 : index
    %1 = vector.load %arg2[%c0_1, %c0_2] : memref<128x384xf32, #tpu.memory_space<vmem>>, vector<128x384xf32>
    %2 = arith.truncf %0 : vector<16x128xf32> to vector<16x128xbf16>
    %3 = arith.truncf %1 : vector<128x384xf32> to vector<128x384xbf16>
    %cst = arith.constant dense<0.000000e+00> : vector<16x384xf32>
    %4 = tpu.matmul %2, %3, %cst {dimension_numbers = #tpu.dot_dimension_numbers<[1], [0], [0], [1], [0, 0, 1, 1], [], []>} : vector<16x128xbf16>, vector<128x384xbf16>, vector<16x384xf32> -> vector<16x384xf32>
    %c0_3 = arith.constant 0 : index
    %c0_4 = arith.constant 0 : index
    %5 = vector.load %arg3[%c0_3, %c0_4] : memref<1x384xf32, #tpu.memory_space<vmem>>, vector<1x384xf32>
    %6 = vector.broadcast %5 : vector<1x384xf32> to vector<16x384xf32>
    %7 = arith.addf %4, %6 : vector<16x384xf32>
    %c0_5 = arith.constant 0 : index
    %c0_6 = arith.constant 0 : index
    %8 = vector.load %arg4[%c0_5, %c0_6] : memref<16x384xf32, #tpu.memory_space<vmem>>, vector<16x384xf32>
    tpu.vector_store %arg4[%c0_5, %c0_6], %7 {strides = array<i32>} : memref<16x384xf32, #tpu.memory_space<vmem>>, vector<16x384xf32>,
    return
  }
  func.func @transform_0(%arg0: i32) -> (i32, i32) {
    %c0_i32 = arith.constant 0 : i32
    %c0_i32_0 = arith.constant 0 : i32
    return %arg0, %c0_i32 : i32, i32
  }
  func.func @transform_1(%arg0: i32) -> (i32, i32) {
    %c0_i32 = arith.constant 0 : i32
    %c0_i32_0 = arith.constant 0 : i32
    %c0_i32_1 = arith.constant 0 : i32
    return %c0_i32, %c0_i32_0 : i32, i32
  }
  func.func @transform_2(%arg0: i32) -> (i32, i32) {
    %c0_i32 = arith.constant 0 : i32
    %c0_i32_0 = arith.constant 0 : i32
    %c0_i32_1 = arith.constant 0 : i32
    return %c0_i32, %c0_i32_0 : i32, i32
  }
  func.func @transform_3(%arg0: i32) -> (i32, i32) {
    %c0_i32 = arith.constant 0 : i32
    %c0_i32_0 = arith.constant 0 : i32
    return %arg0, %c0_i32 : i32, i32
  }
}

module attributes {stable_mosaic.version = 11 : i64} {
  func.func @_linear_res_ln_kernel(%arg0: i32, %arg1: memref<16x128xf32, #tpu.memory_space<vmem>>, %arg2: memref<128x128xf32, #tpu.memory_space<vmem>>, %arg3: memref<1x128xf32, #tpu.memory_space<vmem>>, %arg4: memref<16x128xf32, #tpu.memory_space<vmem>>, %arg5: memref<1x128xf32, #tpu.memory_space<vmem>>, %arg6: memref<1x128xf32, #tpu.memory_space<vmem>>, %arg7: memref<16x128xf32, #tpu.memory_space<vmem>>) attributes {dimension_semantics = [#tpu.dimension_semantics<parallel>], iteration_bounds = array<i64: 1>, scalar_prefetch = 0 : i64, scratch_operands = 0 : i64, tpu.core_type = #tpu.core_type<tc>, window_params = [{transform_indices = @transform_0, window_bounds = array<i64: 16, 128>}, {pipeline_mode = #tpu.pipeline_mode<synchronous>, transform_indices = @transform_1, window_bounds = array<i64: 128, 128>}, {pipeline_mode = #tpu.pipeline_mode<synchronous>, transform_indices = @transform_2, window_bounds = array<i64: 1, 128>}, {transform_indices = @transform_3, window_bounds = array<i64: 16, 128>}, {pipeline_mode = #tpu.pipeline_mode<synchronous>, transform_indices = @transform_4, window_bounds = array<i64: 1, 128>}, {pipeline_mode = #tpu.pipeline_mode<synchronous>, transform_indices = @transform_5, window_bounds = array<i64: 1, 128>}, {transform_indices = @transform_6, window_bounds = array<i64: 16, 128>}]} {
    %c0 = arith.constant 0 : index
    %c0_0 = arith.constant 0 : index
    %0 = vector.load %arg1[%c0, %c0_0] : memref<16x128xf32, #tpu.memory_space<vmem>>, vector<16x128xf32>
    %c0_1 = arith.constant 0 : index
    %c0_2 = arith.constant 0 : index
    %1 = vector.load %arg2[%c0_1, %c0_2] : memref<128x128xf32, #tpu.memory_space<vmem>>, vector<128x128xf32>
    %2 = arith.truncf %0 : vector<16x128xf32> to vector<16x128xbf16>
    %3 = arith.truncf %1 : vector<128x128xf32> to vector<128x128xbf16>
    %cst = arith.constant dense<0.000000e+00> : vector<16x128xf32>
    %4 = tpu.matmul %2, %3, %cst {dimension_numbers = #tpu.dot_dimension_numbers<[1], [0], [0], [1], [0, 0, 1, 1], [], []>} : vector<16x128xbf16>, vector<128x128xbf16>, vector<16x128xf32> -> vector<16x128xf32>
    %c0_3 = arith.constant 0 : index
    %c0_4 = arith.constant 0 : index
    %5 = vector.load %arg3[%c0_3, %c0_4] : memref<1x128xf32, #tpu.memory_space<vmem>>, vector<1x128xf32>
    %6 = vector.broadcast %5 : vector<1x128xf32> to vector<16x128xf32>
    %7 = arith.addf %4, %6 : vector<16x128xf32>
    %c0_5 = arith.constant 0 : index
    %c0_6 = arith.constant 0 : index
    %8 = vector.load %arg4[%c0_5, %c0_6] : memref<16x128xf32, #tpu.memory_space<vmem>>, vector<16x128xf32>
    %9 = arith.addf %7, %8 : vector<16x128xf32>
    %cst_7 = arith.constant dense<0.000000e+00> : vector<16xf32>
    %10 = vector.multi_reduction <add>, %9, %cst_7 [1] : vector<16x128xf32> to vector<16xf32>
    %11 = vector.shape_cast %10 : vector<16xf32> to vector<16x1xf32>
    %cst_8 = arith.constant 1.280000e+02 : f32
    %12 = vector.broadcast %cst_8 : f32 to vector<16x1xf32>
    %13 = arith.divf %11, %12 : vector<16x1xf32>
    %14 = vector.broadcast %13 : vector<16x1xf32> to vector<16x128xf32>
    %15 = arith.subf %9, %14 : vector<16x128xf32>
    %16 = vector.broadcast %13 : vector<16x1xf32> to vector<16x128xf32>
    %17 = arith.subf %9, %16 : vector<16x128xf32>
    %18 = arith.mulf %15, %17 : vector<16x128xf32>
    %cst_9 = arith.constant dense<0.000000e+00> : vector<16xf32>
    %19 = vector.multi_reduction <add>, %18, %cst_9 [1] : vector<16x128xf32> to vector<16xf32>
    %20 = vector.shape_cast %19 : vector<16xf32> to vector<16x1xf32>
    %cst_10 = arith.constant 1.280000e+02 : f32
    %21 = vector.broadcast %cst_10 : f32 to vector<16x1xf32>
    %22 = arith.divf %20, %21 : vector<16x1xf32>
    %23 = vector.broadcast %13 : vector<16x1xf32> to vector<16x128xf32>
    %24 = arith.subf %9, %23 : vector<16x128xf32>
    %cst_11 = arith.constant 9.99999996E-13 : f32
    %25 = vector.broadcast %cst_11 : f32 to vector<16x1xf32>
    %26 = arith.addf %22, %25 : vector<16x1xf32>
    %27 = math.rsqrt %26 : vector<16x1xf32>
    %28 = vector.broadcast %27 : vector<16x1xf32> to vector<16x128xf32>
    %29 = arith.mulf %24, %28 : vector<16x128xf32>
    %c0_12 = arith.constant 0 : index
    %c0_13 = arith.constant 0 : index
    %30 = vector.load %arg5[%c0_12, %c0_13] : memref<1x128xf32, #tpu.memory_space<vmem>>, vector<1x128xf32>
    %31 = vector.broadcast %30 : vector<1x128xf32> to vector<16x128xf32>
    %32 = arith.mulf %29, %31 : vector<16x128xf32>
    %c0_14 = arith.constant 0 : index
    %c0_15 = arith.constant 0 : index
    %33 = vector.load %arg6[%c0_14, %c0_15] : memref<1x128xf32, #tpu.memory_space<vmem>>, vector<1x128xf32>
    %34 = vector.broadcast %33 : vector<1x128xf32> to vector<16x128xf32>
    %35 = arith.addf %32, %34 : vector<16x128xf32>
    %c0_16 = arith.constant 0 : index
    %c0_17 = arith.constant 0 : index
    %36 = vector.load %arg7[%c0_16, %c0_17] : memref<16x128xf32, #tpu.memory_space<vmem>>, vector<16x128xf32>
    tpu.vector_store %arg7[%c0_16, %c0_17], %35 {strides = array<i32>} : memref<16x128xf32, #tpu.memory_space<vmem>>, vector<16x128xf32>,
    return
  }
  func.func @transform_0(%arg0: i32) -> (i32, i32) {
    %c0_i32 = arith.constant 0 : i32
    %c0_i32_0 = arith.constant 0 : i32
    return %arg0, %c0_i32 : i32, i32
  }
  func.func @transform_1(%arg0: i32) -> (i32, i32) {
    %c0_i32 = arith.constant 0 : i32
    %c0_i32_0 = arith.constant 0 : i32
    %c0_i32_1 = arith.constant 0 : i32
    return %c0_i32, %c0_i32_0 : i32, i32
  }
  func.func @transform_2(%arg0: i32) -> (i32, i32) {
    %c0_i32 = arith.constant 0 : i32
    %c0_i32_0 = arith.constant 0 : i32
    %c0_i32_1 = arith.constant 0 : i32
    return %c0_i32, %c0_i32_0 : i32, i32
  }
  func.func @transform_3(%arg0: i32) -> (i32, i32) {
    %c0_i32 = arith.constant 0 : i32
    %c0_i32_0 = arith.constant 0 : i32
    return %arg0, %c0_i32 : i32, i32
  }
  func.func @transform_4(%arg0: i32) -> (i32, i32) {
    %c0_i32 = arith.constant 0 : i32
    %c0_i32_0 = arith.constant 0 : i32
    %c0_i32_1 = arith.constant 0 : i32
    return %c0_i32, %c0_i32_0 : i32, i32
  }
  func.func @transform_5(%arg0: i32) -> (i32, i32) {
    %c0_i32 = arith.constant 0 : i32
    %c0_i32_0 = arith.constant 0 : i32
    %c0_i32_1 = arith.constant 0 : i32
    return %c0_i32, %c0_i32_0 : i32, i32
  }
  func.func @transform_6(%arg0: i32) -> (i32, i32) {
    %c0_i32 = arith.constant 0 : i32
    %c0_i32_0 = arith.constant 0 : i32
    return %arg0, %c0_i32 : i32, i32
  }
}

module attributes {stable_mosaic.version = 11 : i64} {
  func.func @_linear_gelu_kernel(%arg0: i32, %arg1: memref<16x128xf32, #tpu.memory_space<vmem>>, %arg2: memref<128x512xf32, #tpu.memory_space<vmem>>, %arg3: memref<1x512xf32, #tpu.memory_space<vmem>>, %arg4: memref<16x512xf32, #tpu.memory_space<vmem>>) attributes {dimension_semantics = [#tpu.dimension_semantics<parallel>], iteration_bounds = array<i64: 1>, scalar_prefetch = 0 : i64, scratch_operands = 0 : i64, tpu.core_type = #tpu.core_type<tc>, window_params = [{transform_indices = @transform_0, window_bounds = array<i64: 16, 128>}, {pipeline_mode = #tpu.pipeline_mode<synchronous>, transform_indices = @transform_1, window_bounds = array<i64: 128, 512>}, {pipeline_mode = #tpu.pipeline_mode<synchronous>, transform_indices = @transform_2, window_bounds = array<i64: 1, 512>}, {transform_indices = @transform_3, window_bounds = array<i64: 16, 512>}]} {
    %c0 = arith.constant 0 : index
    %c0_0 = arith.constant 0 : index
    %0 = vector.load %arg1[%c0, %c0_0] : memref<16x128xf32, #tpu.memory_space<vmem>>, vector<16x128xf32>
    %c0_1 = arith.constant 0 : index
    %c0_2 = arith.constant 0 : index
    %1 = vector.load %arg2[%c0_1, %c0_2] : memref<128x512xf32, #tpu.memory_space<vmem>>, vector<128x512xf32>
    %2 = arith.truncf %0 : vector<16x128xf32> to vector<16x128xbf16>
    %3 = arith.truncf %1 : vector<128x512xf32> to vector<128x512xbf16>
    %cst = arith.constant dense<0.000000e+00> : vector<16x512xf32>
    %4 = tpu.matmul %2, %3, %cst {dimension_numbers = #tpu.dot_dimension_numbers<[1], [0], [0], [1], [0, 0, 1, 1], [], []>} : vector<16x128xbf16>, vector<128x512xbf16>, vector<16x512xf32> -> vector<16x512xf32>
    %c0_3 = arith.constant 0 : index
    %c0_4 = arith.constant 0 : index
    %5 = vector.load %arg3[%c0_3, %c0_4] : memref<1x512xf32, #tpu.memory_space<vmem>>, vector<1x512xf32>
    %6 = vector.broadcast %5 : vector<1x512xf32> to vector<16x512xf32>
    %7 = arith.addf %4, %6 : vector<16x512xf32>
    %8 = arith.mulf %7, %7 : vector<16x512xf32>
    %9 = arith.mulf %7, %8 : vector<16x512xf32>
    %cst_5 = arith.constant 4.471500e-02 : f32
    %10 = vector.broadcast %cst_5 : f32 to vector<16x512xf32>
    %11 = arith.mulf %10, %9 : vector<16x512xf32>
    %12 = arith.addf %7, %11 : vector<16x512xf32>
    %cst_6 = arith.constant 0.797884583 : f32
    %13 = vector.broadcast %cst_6 : f32 to vector<16x512xf32>
    %14 = arith.mulf %13, %12 : vector<16x512xf32>
    %15 = math.tanh %14 : vector<16x512xf32>
    %cst_7 = arith.constant 1.000000e+00 : f32
    %16 = vector.broadcast %cst_7 : f32 to vector<16x512xf32>
    %17 = arith.addf %16, %15 : vector<16x512xf32>
    %cst_8 = arith.constant 5.000000e-01 : f32
    %18 = vector.broadcast %cst_8 : f32 to vector<16x512xf32>
    %19 = arith.mulf %18, %17 : vector<16x512xf32>
    %20 = arith.mulf %7, %19 : vector<16x512xf32>
    %c0_9 = arith.constant 0 : index
    %c0_10 = arith.constant 0 : index
    %21 = vector.load %arg4[%c0_9, %c0_10] : memref<16x512xf32, #tpu.memory_space<vmem>>, vector<16x512xf32>
    tpu.vector_store %arg4[%c0_9, %c0_10], %20 {strides = array<i32>} : memref<16x512xf32, #tpu.memory_space<vmem>>, vector<16x512xf32>,
    return
  }
  func.func @transform_0(%arg0: i32) -> (i32, i32) {
    %c0_i32 = arith.constant 0 : i32
    %c0_i32_0 = arith.constant 0 : i32
    return %arg0, %c0_i32 : i32, i32
  }
  func.func @transform_1(%arg0: i32) -> (i32, i32) {
    %c0_i32 = arith.constant 0 : i32
    %c0_i32_0 = arith.constant 0 : i32
    %c0_i32_1 = arith.constant 0 : i32
    return %c0_i32, %c0_i32_0 : i32, i32
  }
  func.func @transform_2(%arg0: i32) -> (i32, i32) {
    %c0_i32 = arith.constant 0 : i32
    %c0_i32_0 = arith.constant 0 : i32
    %c0_i32_1 = arith.constant 0 : i32
    return %c0_i32, %c0_i32_0 : i32, i32
  }
  func.func @transform_3(%arg0: i32) -> (i32, i32) {
    %c0_i32 = arith.constant 0 : i32
    %c0_i32_0 = arith.constant 0 : i32
    return %arg0, %c0_i32 : i32, i32
  }
}

module attributes {stable_mosaic.version = 11 : i64} {
  func.func @_linear_kernel(%arg0: i32, %arg1: memref<16x128xf32, #tpu.memory_space<vmem>>, %arg2: memref<128x384xf32, #tpu.memory_space<vmem>>, %arg3: memref<1x384xf32, #tpu.memory_space<vmem>>, %arg4: memref<16x384xf32, #tpu.memory_space<vmem>>) attributes {dimension_semantics = [#tpu.dimension_semantics<parallel>], iteration_bounds = array<i64: 1>, scalar_prefetch = 0 : i64, scratch_operands = 0 : i64, tpu.core_type = #tpu.core_type<tc>, window_params = [{transform_indices = @transform_0, window_bounds = array<i64: 16, 128>}, {pipeline_mode = #tpu.pipeline_mode<synchronous>, transform_indices = @transform_1, window_bounds = array<i64: 128, 384>}, {pipeline_mode = #tpu.pipeline_mode<synchronous>, transform_indices = @transform_2, window_bounds = array<i64: 1, 384>}, {transform_indices = @transform_3, window_bounds = array<i64: 16, 384>}]} {
    %c0 = arith.constant 0 : index
    %c0_0 = arith.constant 0 : index
    %0 = vector.load %arg1[%c0, %c0_0] : memref<16x128xf32, #tpu.memory_space<vmem>>, vector<16x128xf32>
    %c0_1 = arith.constant 0 : index
    %c0_2 = arith.constant 0 : index
    %1 = vector.load %arg2[%c0_1, %c0_2] : memref<128x384xf32, #tpu.memory_space<vmem>>, vector<128x384xf32>
    %2 = arith.truncf %0 : vector<16x128xf32> to vector<16x128xbf16>
    %3 = arith.truncf %1 : vector<128x384xf32> to vector<128x384xbf16>
    %cst = arith.constant dense<0.000000e+00> : vector<16x384xf32>
    %4 = tpu.matmul %2, %3, %cst {dimension_numbers = #tpu.dot_dimension_numbers<[1], [0], [0], [1], [0, 0, 1, 1], [], []>} : vector<16x128xbf16>, vector<128x384xbf16>, vector<16x384xf32> -> vector<16x384xf32>
    %c0_3 = arith.constant 0 : index
    %c0_4 = arith.constant 0 : index
    %5 = vector.load %arg3[%c0_3, %c0_4] : memref<1x384xf32, #tpu.memory_space<vmem>>, vector<1x384xf32>
    %6 = vector.broadcast %5 : vector<1x384xf32> to vector<16x384xf32>
    %7 = arith.addf %4, %6 : vector<16x384xf32>
    %c0_5 = arith.constant 0 : index
    %c0_6 = arith.constant 0 : index
    %8 = vector.load %arg4[%c0_5, %c0_6] : memref<16x384xf32, #tpu.memory_space<vmem>>, vector<16x384xf32>
    tpu.vector_store %arg4[%c0_5, %c0_6], %7 {strides = array<i32>} : memref<16x384xf32, #tpu.memory_space<vmem>>, vector<16x384xf32>,
    return
  }
  func.func @transform_0(%arg0: i32) -> (i32, i32) {
    %c0_i32 = arith.constant 0 : i32
    %c0_i32_0 = arith.constant 0 : i32
    return %arg0, %c0_i32 : i32, i32
  }
  func.func @transform_1(%arg0: i32) -> (i32, i32) {
    %c0_i32 = arith.constant 0 : i32
    %c0_i32_0 = arith.constant 0 : i32
    %c0_i32_1 = arith.constant 0 : i32
    return %c0_i32, %c0_i32_0 : i32, i32
  }
  func.func @transform_2(%arg0: i32) -> (i32, i32) {
    %c0_i32 = arith.constant 0 : i32
    %c0_i32_0 = arith.constant 0 : i32
    %c0_i32_1 = arith.constant 0 : i32
    return %c0_i32, %c0_i32_0 : i32, i32
  }
  func.func @transform_3(%arg0: i32) -> (i32, i32) {
    %c0_i32 = arith.constant 0 : i32
    %c0_i32_0 = arith.constant 0 : i32
    return %arg0, %c0_i32 : i32, i32
  }
}

module attributes {stable_mosaic.version = 11 : i64} {
  func.func @_classify_softmax_kernel(%arg0: i32, %arg1: memref<16x128xf32, #tpu.memory_space<vmem>>, %arg2: memref<128x256xf32, #tpu.memory_space<vmem>>, %arg3: memref<1x256xf32, #tpu.memory_space<vmem>>, %arg4: memref<16x256xf32, #tpu.memory_space<vmem>>) attributes {dimension_semantics = [#tpu.dimension_semantics<parallel>], iteration_bounds = array<i64: 1>, scalar_prefetch = 0 : i64, scratch_operands = 0 : i64, tpu.core_type = #tpu.core_type<tc>, window_params = [{transform_indices = @transform_0, window_bounds = array<i64: 16, 128>}, {pipeline_mode = #tpu.pipeline_mode<synchronous>, transform_indices = @transform_1, window_bounds = array<i64: 128, 256>}, {pipeline_mode = #tpu.pipeline_mode<synchronous>, transform_indices = @transform_2, window_bounds = array<i64: 1, 256>}, {transform_indices = @transform_3, window_bounds = array<i64: 16, 256>}]} {
    %c0 = arith.constant 0 : index
    %c0_0 = arith.constant 0 : index
    %0 = vector.load %arg1[%c0, %c0_0] : memref<16x128xf32, #tpu.memory_space<vmem>>, vector<16x128xf32>
    %c0_1 = arith.constant 0 : index
    %c0_2 = arith.constant 0 : index
    %1 = vector.load %arg2[%c0_1, %c0_2] : memref<128x256xf32, #tpu.memory_space<vmem>>, vector<128x256xf32>
    %2 = arith.truncf %0 : vector<16x128xf32> to vector<16x128xbf16>
    %3 = arith.truncf %1 : vector<128x256xf32> to vector<128x256xbf16>
    %cst = arith.constant dense<0.000000e+00> : vector<16x256xf32>
    %4 = tpu.matmul %2, %3, %cst {dimension_numbers = #tpu.dot_dimension_numbers<[1], [0], [0], [1], [0, 0, 1, 1], [], []>} : vector<16x128xbf16>, vector<128x256xbf16>, vector<16x256xf32> -> vector<16x256xf32>
    %c0_3 = arith.constant 0 : index
    %c0_4 = arith.constant 0 : index
    %5 = vector.load %arg3[%c0_3, %c0_4] : memref<1x256xf32, #tpu.memory_space<vmem>>, vector<1x256xf32>
    %6 = vector.broadcast %5 : vector<1x256xf32> to vector<16x256xf32>
    %7 = arith.addf %4, %6 : vector<16x256xf32>
    %cst_5 = arith.constant dense<0xFF800000> : vector<16xf32>
    %8 = vector.multi_reduction <maximumf>, %7, %cst_5 [1] : vector<16x256xf32> to vector<16xf32>
    %9 = vector.shape_cast %8 : vector<16xf32> to vector<16x1xf32>
    %10 = vector.broadcast %9 : vector<16x1xf32> to vector<16x256xf32>
    %11 = arith.subf %7, %10 : vector<16x256xf32>
    %12 = math.exp %11 : vector<16x256xf32>
    %cst_6 = arith.constant dense<0.000000e+00> : vector<16xf32>
    %13 = vector.multi_reduction <add>, %12, %cst_6 [1] : vector<16x256xf32> to vector<16xf32>
    %14 = vector.shape_cast %13 : vector<16xf32> to vector<16x1xf32>
    %15 = tpu.reciprocal %14 {approx = true} : vector<16x1xf32> -> vector<16x1xf32>
    %16 = vector.broadcast %15 : vector<16x1xf32> to vector<16x256xf32>
    %17 = arith.mulf %12, %16 : vector<16x256xf32>
    %c0_7 = arith.constant 0 : index
    %c0_8 = arith.constant 0 : index
    %18 = vector.load %arg4[%c0_7, %c0_8] : memref<16x256xf32, #tpu.memory_space<vmem>>, vector<16x256xf32>
    tpu.vector_store %arg4[%c0_7, %c0_8], %17 {strides = array<i32>} : memref<16x256xf32, #tpu.memory_space<vmem>>, vector<16x256xf32>,
    return
  }
  func.func @transform_0(%arg0: i32) -> (i32, i32) {
    %c0_i32 = arith.constant 0 : i32
    %c0_i32_0 = arith.constant 0 : i32
    return %arg0, %c0_i32 : i32, i32
  }
  func.func @transform_1(%arg0: i32) -> (i32, i32) {
    %c0_i32 = arith.constant 0 : i32
    %c0_i32_0 = arith.constant 0 : i32
    %c0_i32_1 = arith.constant 0 : i32
    return %c0_i32, %c0_i32_0 : i32, i32
  }
  func.func @transform_2(%arg0: i32) -> (i32, i32) {
    %c0_i32 = arith.constant 0 : i32
    %c0_i32_0 = arith.constant 0 : i32
    %c0_i32_1 = arith.constant 0 : i32
    return %c0_i32, %c0_i32_0 : i32, i32
  }
  func.func @transform_3(%arg0: i32) -> (i32, i32) {
    %c0_i32 = arith.constant 0 : i32
    %c0_i32_0 = arith.constant 0 : i32
    return %arg0, %c0_i32 : i32, i32
  }
}

module attributes {stable_mosaic.version = 11 : i64} {
  func.func @_linear_res_ln_kernel(%arg0: i32, %arg1: memref<16x512xf32, #tpu.memory_space<vmem>>, %arg2: memref<512x128xf32, #tpu.memory_space<vmem>>, %arg3: memref<1x128xf32, #tpu.memory_space<vmem>>, %arg4: memref<16x128xf32, #tpu.memory_space<vmem>>, %arg5: memref<1x128xf32, #tpu.memory_space<vmem>>, %arg6: memref<1x128xf32, #tpu.memory_space<vmem>>, %arg7: memref<16x128xf32, #tpu.memory_space<vmem>>) attributes {dimension_semantics = [#tpu.dimension_semantics<parallel>], iteration_bounds = array<i64: 1>, scalar_prefetch = 0 : i64, scratch_operands = 0 : i64, tpu.core_type = #tpu.core_type<tc>, window_params = [{transform_indices = @transform_0, window_bounds = array<i64: 16, 512>}, {pipeline_mode = #tpu.pipeline_mode<synchronous>, transform_indices = @transform_1, window_bounds = array<i64: 512, 128>}, {pipeline_mode = #tpu.pipeline_mode<synchronous>, transform_indices = @transform_2, window_bounds = array<i64: 1, 128>}, {transform_indices = @transform_3, window_bounds = array<i64: 16, 128>}, {pipeline_mode = #tpu.pipeline_mode<synchronous>, transform_indices = @transform_4, window_bounds = array<i64: 1, 128>}, {pipeline_mode = #tpu.pipeline_mode<synchronous>, transform_indices = @transform_5, window_bounds = array<i64: 1, 128>}, {transform_indices = @transform_6, window_bounds = array<i64: 16, 128>}]} {
    %c0 = arith.constant 0 : index
    %c0_0 = arith.constant 0 : index
    %0 = vector.load %arg1[%c0, %c0_0] : memref<16x512xf32, #tpu.memory_space<vmem>>, vector<16x512xf32>
    %c0_1 = arith.constant 0 : index
    %c0_2 = arith.constant 0 : index
    %1 = vector.load %arg2[%c0_1, %c0_2] : memref<512x128xf32, #tpu.memory_space<vmem>>, vector<512x128xf32>
    %2 = arith.truncf %0 : vector<16x512xf32> to vector<16x512xbf16>
    %3 = arith.truncf %1 : vector<512x128xf32> to vector<512x128xbf16>
    %cst = arith.constant dense<0.000000e+00> : vector<16x128xf32>
    %4 = tpu.matmul %2, %3, %cst {dimension_numbers = #tpu.dot_dimension_numbers<[1], [0], [0], [1], [0, 0, 1, 1], [], []>} : vector<16x512xbf16>, vector<512x128xbf16>, vector<16x128xf32> -> vector<16x128xf32>
    %c0_3 = arith.constant 0 : index
    %c0_4 = arith.constant 0 : index
    %5 = vector.load %arg3[%c0_3, %c0_4] : memref<1x128xf32, #tpu.memory_space<vmem>>, vector<1x128xf32>
    %6 = vector.broadcast %5 : vector<1x128xf32> to vector<16x128xf32>
    %7 = arith.addf %4, %6 : vector<16x128xf32>
    %c0_5 = arith.constant 0 : index
    %c0_6 = arith.constant 0 : index
    %8 = vector.load %arg4[%c0_5, %c0_6] : memref<16x128xf32, #tpu.memory_space<vmem>>, vector<16x128xf32>
    %9 = arith.addf %7, %8 : vector<16x128xf32>
    %cst_7 = arith.constant dense<0.000000e+00> : vector<16xf32>
    %10 = vector.multi_reduction <add>, %9, %cst_7 [1] : vector<16x128xf32> to vector<16xf32>
    %11 = vector.shape_cast %10 : vector<16xf32> to vector<16x1xf32>
    %cst_8 = arith.constant 1.280000e+02 : f32
    %12 = vector.broadcast %cst_8 : f32 to vector<16x1xf32>
    %13 = arith.divf %11, %12 : vector<16x1xf32>
    %14 = vector.broadcast %13 : vector<16x1xf32> to vector<16x128xf32>
    %15 = arith.subf %9, %14 : vector<16x128xf32>
    %16 = vector.broadcast %13 : vector<16x1xf32> to vector<16x128xf32>
    %17 = arith.subf %9, %16 : vector<16x128xf32>
    %18 = arith.mulf %15, %17 : vector<16x128xf32>
    %cst_9 = arith.constant dense<0.000000e+00> : vector<16xf32>
    %19 = vector.multi_reduction <add>, %18, %cst_9 [1] : vector<16x128xf32> to vector<16xf32>
    %20 = vector.shape_cast %19 : vector<16xf32> to vector<16x1xf32>
    %cst_10 = arith.constant 1.280000e+02 : f32
    %21 = vector.broadcast %cst_10 : f32 to vector<16x1xf32>
    %22 = arith.divf %20, %21 : vector<16x1xf32>
    %23 = vector.broadcast %13 : vector<16x1xf32> to vector<16x128xf32>
    %24 = arith.subf %9, %23 : vector<16x128xf32>
    %cst_11 = arith.constant 9.99999996E-13 : f32
    %25 = vector.broadcast %cst_11 : f32 to vector<16x1xf32>
    %26 = arith.addf %22, %25 : vector<16x1xf32>
    %27 = math.rsqrt %26 : vector<16x1xf32>
    %28 = vector.broadcast %27 : vector<16x1xf32> to vector<16x128xf32>
    %29 = arith.mulf %24, %28 : vector<16x128xf32>
    %c0_12 = arith.constant 0 : index
    %c0_13 = arith.constant 0 : index
    %30 = vector.load %arg5[%c0_12, %c0_13] : memref<1x128xf32, #tpu.memory_space<vmem>>, vector<1x128xf32>
    %31 = vector.broadcast %30 : vector<1x128xf32> to vector<16x128xf32>
    %32 = arith.mulf %29, %31 : vector<16x128xf32>
    %c0_14 = arith.constant 0 : index
    %c0_15 = arith.constant 0 : index
    %33 = vector.load %arg6[%c0_14, %c0_15] : memref<1x128xf32, #tpu.memory_space<vmem>>, vector<1x128xf32>
    %34 = vector.broadcast %33 : vector<1x128xf32> to vector<16x128xf32>
    %35 = arith.addf %32, %34 : vector<16x128xf32>
    %c0_16 = arith.constant 0 : index
    %c0_17 = arith.constant 0 : index
    %36 = vector.load %arg7[%c0_16, %c0_17] : memref<16x128xf32, #tpu.memory_space<vmem>>, vector<16x128xf32>
    tpu.vector_store %arg7[%c0_16, %c0_17], %35 {strides = array<i32>} : memref<16x128xf32, #tpu.memory_space<vmem>>, vector<16x128xf32>,
    return
  }
  func.func @transform_0(%arg0: i32) -> (i32, i32) {
    %c0_i32 = arith.constant 0 : i32
    %c0_i32_0 = arith.constant 0 : i32
    return %arg0, %c0_i32 : i32, i32
  }
  func.func @transform_1(%arg0: i32) -> (i32, i32) {
    %c0_i32 = arith.constant 0 : i32
    %c0_i32_0 = arith.constant 0 : i32
    %c0_i32_1 = arith.constant 0 : i32
    return %c0_i32, %c0_i32_0 : i32, i32
  }
  func.func @transform_2(%arg0: i32) -> (i32, i32) {
    %c0_i32 = arith.constant 0 : i32
    %c0_i32_0 = arith.constant 0 : i32
    %c0_i32_1 = arith.constant 0 : i32
    return %c0_i32, %c0_i32_0 : i32, i32
  }
  func.func @transform_3(%arg0: i32) -> (i32, i32) {
    %c0_i32 = arith.constant 0 : i32
    %c0_i32_0 = arith.constant 0 : i32
    return %arg0, %c0_i32 : i32, i32
  }
  func.func @transform_4(%arg0: i32) -> (i32, i32) {
    %c0_i32 = arith.constant 0 : i32
    %c0_i32_0 = arith.constant 0 : i32
    %c0_i32_1 = arith.constant 0 : i32
    return %c0_i32, %c0_i32_0 : i32, i32
  }
  func.func @transform_5(%arg0: i32) -> (i32, i32) {
    %c0_i32 = arith.constant 0 : i32
    %c0_i32_0 = arith.constant 0 : i32
    %c0_i32_1 = arith.constant 0 : i32
    return %c0_i32, %c0_i32_0 : i32, i32
  }
  func.func @transform_6(%arg0: i32) -> (i32, i32) {
    %c0_i32 = arith.constant 0 : i32
    %c0_i32_0 = arith.constant 0 : i32
    return %arg0, %c0_i32 : i32, i32
  }
}

</mosaic_0001>

<bundles_post_ra>
// kernel: _lambda_.14
= control target key start
LH: loop header
LB: loop body
LE: loop exit
PB: predicated region body
PF: predicated region fallthrough
CT: control target
= control target key end

     0   :  { %s554_s9 = smov 0   ;;  %s605_s0 = inlined_call_operand.vmem [shape: f32[16,384], index: 0, kind: input, shape index: {}]   ;;  %s606_s1 = inlined_call_operand.vmem [shape: f32[2,1,8], index: 1, kind: input, shape index: {}]   ;;  %s607_s2 = inlined_call_operand.vmem [shape: f32[16,128], index: 2, kind: output, shape index: {}]  }
   0x1 LB: > { %s462_s10 = sadd.s32 4294967295, %s534_s9   ;;  %p466_p0 = scmp.ge.s32.totalorder %s534_s9, 1  ;;  %s534_s9 = sphi %s554_s9, %s12_s9  }
   0x2   : > { %p120_p1 = scmp.lt.s32.totalorder %s534_s9, 3 }
   0x4   : > { %p121_p2 = pnand %p466_p0, %p120_p1 }
   0x5   : > { %p144_p3 = scmp.lt.s32.totalorder (!%p121_p2), %s462_s10, 1  ;;  %v536_v0 = vmov (!%p121_p2), 0.0   ;;  %vm537_vm0 = vmmov (!%p121_p2), 0   ;;  %vm163_vm1 = vcmask (!%p121_p2), 523264   ;;  %vm218_vm2 = vcmask (!%p121_p2), 64512   ;;  %s538_s18 = smov (!%p121_p2), 64  }
   0x6   : > { %124 = sbr.rel (%p121_p2) target bundleno = 1429 (0x595), region = 28  ;;  %484 = vmatprep.subr.bf16.mxu0 (!%p121_p2), %v536_v0  ;;  %486 = vmatprep.mubr.msk.bf16.mxu0 (!%p121_p2), %vm537_vm0, %v536_v0  ;;  %vm235_vm3 = vcmask (!%p121_p2), 1043456  }
   0x7   : > { %490 = vmatprep.subr.bf16.mxu1 (!%p121_p2), %v536_v0  ;;  %492 = vmatprep.mubr.msk.bf16.mxu1 (!%p121_p2), %vm537_vm0, %v536_v0 }
   0xd   : > { %s609_s10 = smov (!%p144_p3, %s462_s10), 1 }
   0xe   : > { %s508_s11 = smul.u32 24, %s609_s10  ;;  %s151_s17 = scalar_lea.vmem %s606_s1, %s609_s10 }
   0xf   : > { %v470_v7 = vld [vmem:[%s151_s17] ss:$0 sm:$0xff]  ;;  %s468_s19 = sshll.u32 %s609_s10, 3 }
  0x10   : > { %s570_s14 = scalar_lea.vmem %s605_s0, %s508_s11  ;;  %s155_s22 = scalar_lea.vmem %s607_s2, %s468_s19 }
  0x11   : > { %v158_v1 = vld [vmem:[%s570_s14 + $0x8] sm:$0xff]  ;;  %v157_v4 = vld [vmem:[%s570_s14] sm:$0xff]  ;;  %v159_v19 = vld [vmem:[%s570_s14 + $0x10] sm:$0xff] }
  0x12   : > { %v162_v2 = vpack.c.bf16 %v158_v1, %v158_v1  ;;  %v161_v5 = vpack.c.bf16 %v157_v4, %v157_v4  ;;  %v231_v20 = vpack.c.bf16 %v159_v19, %v159_v19 }
  0x14   : > { %v168_v3 = vsel %vm163_vm1, %v162_v2, 0  ;;  %283 = vrot.lane.b32.xlu1 %v162_v2, %s538_s18  ;;  %v237_v21 = vsel %vm235_vm3, %v231_v20, 0 }
  0x15   : > { %485 = vmatpush3.bf16.xpose.msra.mxu0 %v168_v3  ;;  %491 = vmatpush3.bf16.msra.mxu1 %v237_v21 }
  0x16   : > { %502 = vmatprep.subr.bf16.mxu0 %v536_v0  ;;  %496 = vmatprep.subr.bf16.mxu1 %v536_v0 }
  0x18   : > { %280 = vrot.lane.b32.xlu1 %v161_v5, %s538_s18 }
  0x1c   : > { %487 = vmatmul.mubr.msk.bf16.vlgmr.msra.gmra.mrb[0].mxu0 %vm163_vm1, %v161_v5 }
  0x1d   : > { %504 = vmatprep.mubr.msk.bf16.mxu0 %vm537_vm0, %v536_v0 }
  0x86   : > { %v284_v24 = vpop.permute.xlu1 %283 }
  0x87   : > { %v289_v26 = vsel %vm163_vm1, %v284_v24, 0 }
  0x8a   : > { %v281_v28 = vpop.permute.xlu1 %280 }
  0xef   : > { %v204_v6 = vpop.f32.mrb[0].mxu0 }
  0xf0   : > { %v210_v8 = vmul.f32 0.125, %v204_v6  ;;  %v488_v9 = vpop.f32.mrb[1].mxu0 }
  0xf1   : > { %v207_v10 = vpop.f32.mrb[2].mxu0 }
  0xf2   : > { %v489_v11 = vpop.f32.mrb[3].mxu0  ;;  %v217_v12 = vadd.f32 %v470_v7, %v210_v8 }
  0xf4   : > { %v219_v13 = vsel %vm218_vm2, %v217_v12, -inf }
  0xf5   : > { %220 = vmax.xlane.f32.xlu0 %v219_v13 }
 0x182   : > { %v221_v14 = vpop.xlane.xlu0 %220 }
 0x183   : > { %v222_v15 = vsub.f32 %v217_v12, %v221_v14 }
 0x185   : > { %v223_v16 = vmul.f32 1.442695, %v222_v15 }
 0x187   : > { %520 = vpow2.f32 %v223_v16 }
 0x191   : > { %v521_v17 = vpop.eup %520 }
 0x192   : > { %v225_v18 = vsel %vm218_vm2, %v521_v17, 0.0 }
 0x193   : > { %226 = vadd.xlane.f32.xlu0 %v225_v18 }
 0x220   : > { %v227_v22 = vpop.xlane.xlu0 %226 }
 0x221   : > { %522 = vrcp.f32 %v227_v22 }
 0x22b   : > { %v523_v23 = vpop.eup %522 }
 0x22c   : > { %v229_v25 = vmul.f32 %v523_v23, %v521_v17 }
 0x22e   : > { %v230_v27 = vpack.c.bf16 %v229_v25, %v229_v25 }
 0x230   : > { %493 = vmatmul.mubr.msk.bf16.vlgmr.msra.gmra.mrb[0].mxu1 %vm218_vm2, %v230_v27 }
 0x231   : > { %497 = vmatpush3.bf16.xpose.msra.mxu1 %v289_v26  ;;  %498 = vmatprep.mubr.msk.bf16.mxu1 %vm537_vm0, %v536_v0 }
 0x238   : > { %499 = vmatmul.mubr.msk.bf16.vlgmr.msra.gmra.mrb[4].mxu1 %vm163_vm1, %v281_v28 }
 0x303   : > { %v273_v29 = vpop.f32.mrb[0].mxu1 }
 0x304   : > { %v494_v30 = vpop.f32.mrb[1].mxu1 }
 0x305   : > { %v276_v31 = vpop.f32.mrb[2].mxu1 }
 0x306   : > { %v495_v32 = vpop.f32.mrb[3].mxu1 }
 0x30b   : > { %v325_v33 = vpop.f32.mrb[4].mxu1 }
 0x30c   : > { %v331_v34 = vmul.f32 0.125, %v325_v33  ;;  %v500_v35 = vpop.f32.mrb[5].mxu1 }
 0x30d   : > { %v328_v36 = vpop.f32.mrb[6].mxu1 }
 0x30e   : > { %v501_v37 = vpop.f32.mrb[7].mxu1  ;;  %v332_v38 = vadd.f32 %v470_v7, %v331_v34 }
 0x310   : > { %v333_v39 = vsel %vm218_vm2, %v332_v38, -inf }
 0x311   : > { %334 = vmax.xlane.f32.xlu0 %v333_v39 }
 0x327   : > { %346 = vrot.lane.b32.xlu0 %v231_v20, %s538_s18 }
 0x39e   : > { %v335_v40 = vpop.xlane.xlu0 %334 }
 0x39f   : > { %v336_v41 = vsub.f32 %v332_v38, %v335_v40 }
 0x3a1   : > { %v337_v42 = vmul.f32 1.442695, %v336_v41 }
 0x3a2   : > { %v347_v45 = vpop.permute.xlu0 %346 }
 0x3a3   : > { %524 = vpow2.f32 %v337_v42  ;;  %v352_v46 = vsel %vm235_vm3, %v347_v45, 0 }
 0x3a4   : > { %503 = vmatpush3.bf16.msra.mxu0 %v352_v46 }
 0x3ad   : > { %v525_v43 = vpop.eup %524 }
 0x3ae   : > { %v339_v44 = vsel %vm218_vm2, %v525_v43, 0.0 }
 0x3af   : > { %340 = vadd.xlane.f32.xlu1 %v339_v44 }
 0x43c   : > { %v341_v47 = vpop.xlane.xlu1 %340 }
 0x43d   : > { %526 = vrcp.f32 %v341_v47 }
 0x447   : > { %v527_v48 = vpop.eup %526 }
 0x448   : > { %v343_v49 = vmul.f32 %v527_v48, %v525_v43 }
 0x44a   : > { %v344_v50 = vpack.c.bf16 %v343_v49, %v343_v49 }
 0x44c   : > { %505 = vmatmul.mubr.msk.bf16.vlgmr.msra.gmra.mrb[4].mxu0 %vm218_vm2, %v344_v50 }
 0x51f   : > { %v388_v51 = vpop.f32.mrb[4].mxu0 }
 0x520   : > { %395 = vrot.lane.b32.xlu0 %v388_v51, %s538_s18  ;;  %v506_v52 = vpop.f32.mrb[5].mxu0 }
 0x521   : > { %v391_v53 = vpop.f32.mrb[6].mxu0 }
 0x522   : > { %v507_v54 = vpop.f32.mrb[7].mxu0 }
 0x592   : > { %v396_v55 = vpop.permute.xlu0 %395 }
 0x593   : > { %v398_v56 = vsel %vm163_vm1, %v273_v29, %v396_v55 }
 0x594   : > { %399 = vst [vmem:[%s155_s22] sm:$0xff] %v398_v56 }
 0x595 PF: > { %s12_s9 = sadd.s32 1, %s534_s9  }
 0x596   : > { %p9_p4 = scmp.ge.s32.totalorder %s12_s9, 4  }
 0x598   :  { %11 = sbr.rel (!%p9_p4) target bundleno = 1 (0x1), region = 61 }

// kernel: _lambda_.12
= control target key start
LH: loop header
LB: loop body
LE: loop exit
PB: predicated region body
PF: predicated region fallthrough
CT: control target
= control target key end

     0   :  { %s332_s15 = smov 0   ;;  %s358_s0 = inlined_call_operand.vmem [shape: f32[16,128], index: 0, kind: input, shape index: {}]   ;;  %s359_s1 = inlined_call_operand.vmem [shape: f32[8,128], index: 1, kind: input, shape index: {}]   ;;  %s360_s2 = inlined_call_operand.vmem [shape: f32[1,128], index: 2, kind: input, shape index: {}]   ;;  %s361_s3 = inlined_call_operand.vmem [shape: f32[1,128], index: 3, kind: input, shape index: {}]   ;;  %s362_s4 = inlined_call_operand.vmem [shape: f32[16,128], index: 4, kind: output, shape index: {}]  }
   0x1 LB: > { %s278_s16 = sadd.s32 4294967295, %s305_s15   ;;  %p282_p0 = scmp.ge.s32.totalorder %s305_s15, 1  ;;  %s305_s15 = sphi %s332_s15, %s14_s15  }
   0x2   : > { %p161_p1 = scmp.lt.s32.totalorder %s305_s15, 3 }
   0x4   : > { %p162_p2 = pnand %p282_p0, %p161_p1 }
   0x5   : > { %p185_p3 = scmp.lt.s32.totalorder (!%p162_p2), %s278_s16, 1  ;;  %v194_v0 = vld [vmem:[%s359_s1] sm:$0xff] (!%p162_p2) }
   0x6   : > { %165 = sbr.rel (%p162_p2) target bundleno = 331 (0x14b), region = 36  ;;  %v285_v11 = vld [vmem:[%s360_s2] ss:$0 sm:$0xff] (!%p162_p2) }
   0x7   : > { %v286_v13 = vld [vmem:[%s361_s3] ss:$0 sm:$0xff] (!%p162_p2) }
   0xd   : > { %s364_s16 = smov (!%p185_p3, %s278_s16), 1 }
   0xe   : > { %s283_s17 = sshll.u32 %s364_s16, 3 }
   0xf   : > { %s188_s22 = scalar_lea.vmem %s358_s0, %s283_s17  ;;  %s192_s29 = scalar_lea.vmem %s362_s4, %s283_s17 }
  0x10   : > { %v193_v1 = vld [vmem:[%s188_s22] sm:$0xff] }
  0x11   : > { %v195_v2 = vadd.f32 %v194_v0, %v193_v1 }
  0x13   : > { %196 = vadd.xlane.f32.xlu0 %v195_v2 }
  0xa0   : > { %v197_v3 = vpop.xlane.xlu0 %196 }
  0xa1   : > { %v199_v4 = vmul.f32 0.0078125, %v197_v3 }
  0xa3   : > { %v200_v5 = vsub.f32 %v195_v2, %v199_v4 }
  0xa5   : > { %v201_v6 = vmul.f32 %v200_v5, %v200_v5 }
  0xa7   : > { %202 = vadd.xlane.f32.xlu0 %v201_v6 }
 0x134   : > { %v203_v7 = vpop.xlane.xlu0 %202 }
 0x135   : > { %v204_v8 = vmul.f32 0.0078125, %v203_v7 }
 0x137   : > { %v205_v9 = vadd.f32 1e-12, %v204_v8 }
 0x139   : > { %297 = vrsqrt.f32 %v205_v9 }
 0x143   : > { %v298_v10 = vpop.eup %297 }
 0x144   : > { %v207_v12 = vmul.f32 %v298_v10, %v200_v5 }
 0x146   : > { %v215_v14 = vmul.f32 %v285_v11, %v207_v12 }
 0x148   : > { %v223_v15 = vadd.f32 %v286_v13, %v215_v14 }
 0x14a   : > { %224 = vst [vmem:[%s192_s29] sm:$0xff] %v223_v15 }
 0x14b PF: > { %s14_s15 = sadd.s32 1, %s305_s15  }
 0x14c   : > { %p11_p4 = scmp.ge.s32.totalorder %s14_s15, 4  }
 0x14e   :  { %13 = sbr.rel (!%p11_p4) target bundleno = 1 (0x1), region = 66 }

// kernel: _lambda_.13
= control target key start
LH: loop header
LB: loop body
LE: loop exit
PB: predicated region body
PF: predicated region fallthrough
CT: control target
= control target key end

     0   :  { %8 = vsyncpa [#allocation3], 0  ;;  %s275_s12 = smov [#allocation2]   ;;  %s349_s0 = inlined_call_operand.vmem [shape: f32[16,128], index: 0, kind: input, shape index: {}]   ;;  %s350_s1 = inlined_call_operand.hbm [shape: f32[128,384], index: 1, kind: input, shape index: {}]   ;;  %s351_s2 = inlined_call_operand.vmem [shape: f32[1,384], index: 2, kind: input, shape index: {}]   ;;  %s352_s3 = inlined_call_operand.vmem [shape: f32[16,384], index: 3, kind: output, shape index: {}]  }
   0x1   :  { %s16_s13 = sshll.u32 %s275_s12, 4  ;;  %s251_s16 = scalar_lea.hbm %s350_s1, 6144  ;;  %s17_s13 = int_to_ptr.vmem [resolvable:$true] %s16_s13 }
   0x2   :  { %p252_p0 = scmp.ne.s32.totalorder %s350_s1, %s251_s16  ;;  %p255_p1 = scmp.lt.u32.totalorder %s251_s16, %s350_s1 }
   0x4   :  { %p257_p2 = pnand %p255_p1, %p252_p0 }
   0x6   :  { %260 = shalt.err (!%p257_p2)
}
   0x7   :  { %s261_s21 = scalar_lea.vmem %s17_s13, 6144  ;;  %p266_p4 = scmp.lt.s32.totalorder %s17_s13, %s17_s13 }
   0x8   :  { %p262_p3 = scmp.ne.s32.totalorder %s17_s13, %s261_s21  ;;  %p267_p5 = scmp.lt.s32.totalorder %s261_s21, %s261_s21 }
   0xa   :  { %p268_p6 = por %p267_p5, %p266_p4 }
   0xc   :  { %p269_p7 = pnand %p268_p6, %p262_p3 }
   0xe   :  { %272 = shalt.err (!%p269_p7)
}
   0xf   :  { %s276_s22 = smov 384   ;;  %s277_s23 = smov 24  }
  0x10   :  { %22 = dma.hbm_to_vmem [thread:$0]  %s350_s1, 6144, %s17_s13, [#allocation3], %s276_s22, %s276_s22, %s277_s23  }
  0x11   :  { %273 = dma.done.wait [#allocation3], 6144  }
  0x12   :  { %274 = vsyncadd [#allocation3], 4294961152  ;;  %v278_v0 = vmov 0.0   ;;  %vm279_vm0 = vmmov 0   ;;  %v280_v1 = vmov 0   ;;  %v32_v2 = vld [vmem:[#allocation2 + $0x8] sm:$0xff] }
  0x13   :  { %225 = vmatprep.subr.bf16.mxu1 %v278_v0  ;;  %241 = vmatprep.mubr.msk.bf16.mxu1 %vm279_vm0, %v278_v0  ;;  %v35_v3 = vld [vmem:[#allocation2 + $0x20] sm:$0xff]  ;;  %v33_v4 = vld [vmem:[#allocation2 + $0x10] sm:$0xff]  ;;  %v36_v6 = vld [vmem:[#allocation2 + $0x28] sm:$0xff] }
  0x14   :  { %153 = vmatprep.mubr.bf16.mxu0 %v280_v1  ;;  %v81_v5 = vpack.c.bf16 %v35_v3, %v32_v2  ;;  %v31_v7 = vld [vmem:[#allocation2] sm:$0xff]  ;;  %v34_v8 = vld [vmem:[#allocation2 + $0x18] sm:$0xff]  ;;  %v82_v9 = vpack.c.bf16 %v36_v6, %v33_v4  ;;  %v41_v12 = vld [vmem:[#allocation2 + $0x50] sm:$0xff] }
  0x15   :  { %v80_v10 = vpack.c.bf16 %v34_v8, %v31_v7  ;;  %v38_v11 = vld [vmem:[#allocation2 + $0x38] sm:$0xff]  ;;  %v39_v13 = vld [vmem:[#allocation2 + $0x40] sm:$0xff]  ;;  %v37_v16 = vld [vmem:[#allocation2 + $0x30] sm:$0xff] }
  0x16   :  { %121 = vmatprep.subr.bf16.mxu0 %v81_v5  ;;  %v84_v14 = vpack.c.bf16 %v41_v12, %v38_v11  ;;  %v42_v15 = vld [vmem:[#allocation2 + $0x58] sm:$0xff]  ;;  %v40_v17 = vld [vmem:[#allocation2 + $0x48] sm:$0xff]  ;;  %226 = vmatpush3.bf16.msra.mxu1 %v82_v9  ;;  %v47_v21 = vld [vmem:[#allocation2 + $0x80] sm:$0xff] }
  0x17   :  { %122 = vmatpush1.bf16.msra.mxu0 %v80_v10  ;;  %v85_v18 = vpack.c.bf16 %v42_v15, %v39_v13  ;;  %v83_v19 = vpack.c.bf16 %v40_v17, %v37_v16  ;;  %v44_v20 = vld [vmem:[#allocation2 + $0x68] sm:$0xff]  ;;  %v45_v22 = vld [vmem:[#allocation2 + $0x70] sm:$0xff]  ;;  %227 = vmatprep.subr.bf16.mxu1 %v278_v0  ;;  %v43_v25 = vld [vmem:[#allocation2 + $0x60] sm:$0xff] }
  0x18   :  { %123 = vmatprep.subr.bf16.mxu0 %v84_v14  ;;  %v87_v23 = vpack.c.bf16 %v47_v21, %v44_v20  ;;  %v48_v24 = vld [vmem:[#allocation2 + $0x88] sm:$0xff]  ;;  %v46_v26 = vld [vmem:[#allocation2 + $0x78] sm:$0xff]  ;;  %v53_v28 = vld [vmem:[#allocation2 + $0xb0] sm:$0xff]  ;;  %v106_v14 = vlaneseq }
  0x19   :  { %v50_v27 = vld [vmem:[#allocation2 + $0x98] sm:$0xff]  ;;  %v88_v29 = vpack.c.bf16 %v48_v24, %v45_v22  ;;  %v86_v30 = vpack.c.bf16 %v46_v26, %v43_v25  ;;  %v51_v31 = vld [vmem:[#allocation2 + $0xa0] sm:$0xff]  ;;  %v49_v34 = vld [vmem:[#allocation2 + $0x90] sm:$0xff] }
  0x1a   :  { %228 = vmatpush3.bf16.msra.mxu1 %v85_v18  ;;  %v90_v32 = vpack.c.bf16 %v53_v28, %v50_v27  ;;  %v54_v33 = vld [vmem:[#allocation2 + $0xb8] sm:$0xff]  ;;  %v52_v35 = vld [vmem:[#allocation2 + $0xa8] sm:$0xff]  ;;  %v59_v37 = vld [vmem:[#allocation2 + $0xe0] sm:$0xff]  ;;  %v107_v15 = vshrl.u32 %v106_v14, 7 }
  0x1b   :  { %124 = vmatpush1.bf16.msra.mxu0 %v83_v19  ;;  %229 = vmatprep.subr.bf16.mxu1 %v278_v0  ;;  %v56_v36 = vld [vmem:[#allocation2 + $0xc8] sm:$0xff]  ;;  %v91_v38 = vpack.c.bf16 %v54_v33, %v51_v31  ;;  %v89_v39 = vpack.c.bf16 %v52_v35, %v49_v34  ;;  %v57_v40 = vld [vmem:[#allocation2 + $0xd0] sm:$0xff]  ;;  %v55_v43 = vld [vmem:[#allocation2 + $0xc0] sm:$0xff] }
  0x1c   :  { %125 = vmatprep.subr.bf16.mxu0 %v87_v23  ;;  %v93_v41 = vpack.c.bf16 %v59_v37, %v56_v36  ;;  %v60_v42 = vld [vmem:[#allocation2 + $0xe8] sm:$0xff]  ;;  %v58_v44 = vld [vmem:[#allocation2 + $0xd8] sm:$0xff]  ;;  %v65_v46 = vld [vmem:[#allocation2 + $0x110] sm:$0xff]  ;;  %v116_v16 = vsub.s32 2, %v107_v15  ;;  %v108_v17 = vsub.s32 0, %v107_v15  ;;  %v112_v19 = vsub.s32 1, %v107_v15 }
  0x1d   :  { %v62_v45 = vld [vmem:[#allocation2 + $0xf8] sm:$0xff]  ;;  %v94_v47 = vpack.c.bf16 %v60_v42, %v57_v40  ;;  %v92_v48 = vpack.c.bf16 %v58_v44, %v55_v43  ;;  %v63_v49 = vld [vmem:[#allocation2 + $0x100] sm:$0xff]  ;;  %v61_v52 = vld [vmem:[#allocation2 + $0xf0] sm:$0xff] }
  0x1e   :  { %230 = vmatpush3.bf16.msra.mxu1 %v88_v29  ;;  %v96_v50 = vpack.c.bf16 %v65_v46, %v62_v45  ;;  %v66_v51 = vld [vmem:[#allocation2 + $0x118] sm:$0xff]  ;;  %v64_v53 = vld [vmem:[#allocation2 + $0x108] sm:$0xff]  ;;  %v71_v55 = vld [vmem:[#allocation2 + $0x140] sm:$0xff] }
  0x1f   :  { %126 = vmatpush1.bf16.msra.mxu0 %v86_v30  ;;  %231 = vmatprep.subr.bf16.mxu1 %v278_v0  ;;  %v68_v54 = vld [vmem:[#allocation2 + $0x128] sm:$0xff]  ;;  %v97_v56 = vpack.c.bf16 %v66_v51, %v63_v49  ;;  %v95_v57 = vpack.c.bf16 %v64_v53, %v61_v52  ;;  %v69_v58 = vld [vmem:[#allocation2 + $0x130] sm:$0xff]  ;;  %v67_v61 = vld [vmem:[#allocation2 + $0x120] sm:$0xff] }
  0x20   :  { %127 = vmatprep.subr.bf16.mxu0 %v90_v32  ;;  %v99_v59 = vpack.c.bf16 %v71_v55, %v68_v54  ;;  %v72_v60 = vld [vmem:[#allocation2 + $0x148] sm:$0xff]  ;;  %v70_v62 = vld [vmem:[#allocation2 + $0x138] sm:$0xff]  ;;  %v77_v1 = vld [vmem:[#allocation2 + $0x170] sm:$0xff] }
  0x21   :  { %v74_v63 = vld [vmem:[#allocation2 + $0x158] sm:$0xff]  ;;  %v100_v2 = vpack.c.bf16 %v72_v60, %v69_v58  ;;  %v98_v3 = vpack.c.bf16 %v70_v62, %v67_v61  ;;  %v75_v4 = vld [vmem:[#allocation2 + $0x160] sm:$0xff]  ;;  %v73_v7 = vld [vmem:[#allocation2 + $0x150] sm:$0xff] }
  0x22   :  { %232 = vmatpush3.bf16.msra.mxu1 %v91_v38  ;;  %v102_v5 = vpack.c.bf16 %v77_v1, %v74_v63  ;;  %v78_v6 = vld [vmem:[#allocation2 + $0x178] sm:$0xff]  ;;  %v76_v8 = vld [vmem:[#allocation2 + $0x168] sm:$0xff]  ;;  %v29_v11 = vld [vmem:[%s349_s0] sm:$0xff] }
  0x23   :  { %128 = vmatpush1.bf16.msra.mxu0 %v89_v39  ;;  %233 = vmatprep.subr.bf16.mxu1 %v278_v0  ;;  %v103_v9 = vpack.c.bf16 %v78_v6, %v75_v4  ;;  %v101_v10 = vpack.c.bf16 %v76_v8, %v73_v7  ;;  %v30_v12 = vld [vmem:[%s349_s0 + $0x8] sm:$0xff]  ;;  %v104_v18 = vld [vmem:[%s351_s2] sm:$0x7] }
  0x24   :  { %129 = vmatprep.subr.bf16.mxu0 %v93_v41  ;;  %v79_v13 = vpack.c.bf16 %v30_v12, %v29_v11  ;;  %v117_v20 = vrot.slane %v104_v18, %v116_v16  ;;  %v109_v21 = vrot.slane %v104_v18, %v108_v17  ;;  %v113_v22 = vrot.slane %v104_v18, %v112_v19 }
  0x26   :  { %234 = vmatpush3.bf16.msra.mxu1 %v94_v47 }
  0x27   :  { %130 = vmatpush1.bf16.msra.mxu0 %v92_v48  ;;  %235 = vmatprep.subr.bf16.mxu1 %v278_v0 }
  0x28   :  { %131 = vmatprep.subr.bf16.mxu0 %v96_v50 }
  0x2a   :  { %236 = vmatpush3.bf16.msra.mxu1 %v97_v56 }
  0x2b   :  { %132 = vmatpush1.bf16.msra.mxu0 %v95_v57  ;;  %237 = vmatprep.subr.bf16.mxu1 %v278_v0 }
  0x2c   :  { %133 = vmatprep.subr.bf16.mxu0 %v99_v59 }
  0x2e   :  { %238 = vmatpush3.bf16.msra.mxu1 %v100_v2 }
  0x2f   :  { %134 = vmatpush1.bf16.msra.mxu0 %v98_v3  ;;  %239 = vmatprep.subr.bf16.mxu1 %v278_v0 }
  0x30   :  { %135 = vmatprep.subr.bf16.mxu0 %v102_v5 }
  0x32   :  { %240 = vmatpush3.bf16.msra.mxu1 %v103_v9 }
  0x33   :  { %136 = vmatpush1.bf16.msra.mxu0 %v101_v10 }
  0x35   :  { %242 = vmatmul.mubr.bf16.vlgmr.msra.gmra.mrb[0].mxu1 %v79_v13 }
  0x36   :  { %154 = vmatmul.mubr.bf16.vlgmr.msra.gmra.mrb[0].mxu0 %v79_v13 }
 0x108   :  { %v198_v23 = vpop.f32.mrb[0].mxu1 }
 0x109   :  { %v155_v0 = vpop.f32.mrb[0].mxu0  ;;  %v199_v24 = vadd.f32 %v198_v23, %v117_v20  ;;  %v243_v26 = vpop.f32.mrb[1].mxu1 }
 0x10a   :  { %v156_v25 = vadd.f32 %v155_v0, %v109_v21  ;;  %v157_v27 = vpop.f32.mrb[1].mxu0  ;;  %v201_v29 = vpop.f32.mrb[2].mxu1 }
 0x10b   :  { %v158_v28 = vadd.f32 %v157_v27, %v113_v22  ;;  %v159_v30 = vpop.f32.mrb[2].mxu0  ;;  %207 = vst [vmem:[%s352_s3 + $0x10] sm:$0xff] %v199_v24  ;;  %v202_v31 = vadd.f32 %v201_v29, %v117_v20  ;;  %v244_v33 = vpop.f32.mrb[3].mxu1 }
 0x10c   :  { %205 = vst [vmem:[%s352_s3] sm:$0xff] %v156_v25  ;;  %v160_v32 = vadd.f32 %v159_v30, %v109_v21  ;;  %v161_v34 = vpop.f32.mrb[3].mxu0 }
 0x10d   :  { %206 = vst [vmem:[%s352_s3 + $0x8] sm:$0xff] %v158_v28  ;;  %v162_v35 = vadd.f32 %v161_v34, %v113_v22  ;;  %210 = vst [vmem:[%s352_s3 + $0x28] sm:$0xff] %v202_v31 }
 0x10e   :  { %208 = vst [vmem:[%s352_s3 + $0x18] sm:$0xff] %v160_v32 }
 0x10f   :  { %209 = vst [vmem:[%s352_s3 + $0x20] sm:$0xff] %v162_v35 }
 0x110   :  { %215 = vsyncpa [#allocation3], 1 }

// kernel: _lambda_.15
= control target key start
LH: loop header
LB: loop body
LE: loop exit
PB: predicated region body
PF: predicated region fallthrough
CT: control target
= control target key end

     0   :  { %v188_v0 = vmov 0.0   ;;  %vm189_vm0 = vmmov 0   ;;  %s300_s1 = inlined_call_operand.vmem [shape: f32[128,128], index: 1, kind: input, shape index: {}]   ;;  %s301_s0 = inlined_call_operand.vmem [shape: f32[16,128], index: 0, kind: input, shape index: {}]   ;;  %s302_s2 = inlined_call_operand.vmem [shape: f32[1,128], index: 2, kind: input, shape index: {}]   ;;  %s303_s3 = inlined_call_operand.vmem [shape: f32[16,128], index: 3, kind: input, shape index: {}]   ;;  %s304_s4 = inlined_call_operand.vmem [shape: f32[1,128], index: 4, kind: input, shape index: {}]   ;;  %s305_s5 = inlined_call_operand.vmem [shape: f32[1,128], index: 5, kind: input, shape index: {}]   ;;  %s306_s6 = inlined_call_operand.vmem [shape: f32[16,128], index: 6, kind: output, shape index: {}]  }
   0x1   :  { %162 = vmatprep.subr.bf16.mxu0 %v188_v0  ;;  %v26_v1 = vld [vmem:[%s300_s1] sm:$0xff]  ;;  %v27_v2 = vld [vmem:[%s300_s1 + $0x8] sm:$0xff]  ;;  %v28_v3 = vld [vmem:[%s300_s1 + $0x10] sm:$0xff]  ;;  %178 = vmatprep.mubr.msk.bf16.mxu0 %vm189_vm0, %v188_v0 }
   0x2   :  { %v43_v4 = vpack.c.bf16 %v27_v2, %v26_v1  ;;  %v29_v5 = vld [vmem:[%s300_s1 + $0x18] sm:$0xff]  ;;  %v30_v7 = vld [vmem:[%s300_s1 + $0x20] sm:$0xff]  ;;  %v31_v8 = vld [vmem:[%s300_s1 + $0x28] sm:$0xff] }
   0x3   :  { %v44_v6 = vpack.c.bf16 %v29_v5, %v28_v3  ;;  %v45_v9 = vpack.c.bf16 %v31_v8, %v30_v7  ;;  %v32_v10 = vld [vmem:[%s300_s1 + $0x30] sm:$0xff]  ;;  %v33_v11 = vld [vmem:[%s300_s1 + $0x38] sm:$0xff]  ;;  %v34_v13 = vld [vmem:[%s300_s1 + $0x40] sm:$0xff] }
   0x4   :  { %163 = vmatpush3.bf16.msra.mxu0 %v43_v4  ;;  %v46_v12 = vpack.c.bf16 %v33_v11, %v32_v10  ;;  %v35_v14 = vld [vmem:[%s300_s1 + $0x48] sm:$0xff]  ;;  %v36_v16 = vld [vmem:[%s300_s1 + $0x50] sm:$0xff]  ;;  %v37_v17 = vld [vmem:[%s300_s1 + $0x58] sm:$0xff] }
   0x5   :  { %164 = vmatprep.subr.bf16.mxu0 %v188_v0  ;;  %v47_v15 = vpack.c.bf16 %v35_v14, %v34_v13  ;;  %v48_v18 = vpack.c.bf16 %v37_v17, %v36_v16  ;;  %v38_v19 = vld [vmem:[%s300_s1 + $0x60] sm:$0xff]  ;;  %v39_v20 = vld [vmem:[%s300_s1 + $0x68] sm:$0xff]  ;;  %v40_v22 = vld [vmem:[%s300_s1 + $0x70] sm:$0xff] }
   0x6   :  { %v49_v21 = vpack.c.bf16 %v39_v20, %v38_v19  ;;  %v41_v23 = vld [vmem:[%s300_s1 + $0x78] sm:$0xff]  ;;  %v24_v25 = vld [vmem:[%s301_s0] sm:$0xff]  ;;  %v25_v26 = vld [vmem:[%s301_s0 + $0x8] sm:$0xff] }
   0x7   :  { %v50_v24 = vpack.c.bf16 %v41_v23, %v40_v22  ;;  %v42_v27 = vpack.c.bf16 %v25_v26, %v24_v25  ;;  %v150_v28 = vld [vmem:[%s302_s2] ss:$0 sm:$0xff]  ;;  %v100_v37 = vld [vmem:[%s303_s3 + $0x8] sm:$0xff] }
   0x8   :  { %165 = vmatpush3.bf16.msra.mxu0 %v44_v6  ;;  %v99_v30 = vld [vmem:[%s303_s3] sm:$0xff] }
   0x9   :  { %166 = vmatprep.subr.bf16.mxu0 %v188_v0  ;;  %v151_v54 = vld [vmem:[%s304_s4] ss:$0 sm:$0xff] }
   0xa   :  { %v152_v56 = vld [vmem:[%s305_s5] ss:$0 sm:$0xff] }
   0xc   :  { %167 = vmatpush3.bf16.msra.mxu0 %v45_v9 }
   0xd   :  { %168 = vmatprep.subr.bf16.mxu0 %v188_v0 }
  0x10   :  { %169 = vmatpush3.bf16.msra.mxu0 %v46_v12 }
  0x11   :  { %170 = vmatprep.subr.bf16.mxu0 %v188_v0 }
  0x14   :  { %171 = vmatpush3.bf16.msra.mxu0 %v47_v15 }
  0x15   :  { %172 = vmatprep.subr.bf16.mxu0 %v188_v0 }
  0x18   :  { %173 = vmatpush3.bf16.msra.mxu0 %v48_v18 }
  0x19   :  { %174 = vmatprep.subr.bf16.mxu0 %v188_v0 }
  0x1c   :  { %175 = vmatpush3.bf16.msra.mxu0 %v49_v21 }
  0x1d   :  { %176 = vmatprep.subr.bf16.mxu0 %v188_v0 }
  0x20   :  { %177 = vmatpush3.bf16.msra.mxu0 %v50_v24 }
  0x23   :  { %179 = vmatmul.mubr.bf16.vlgmr.msra.gmra.mrb[0].mxu0 %v42_v27 }
  0xf6   :  { %v92_v29 = vpop.f32.mrb[0].mxu0 }
  0xf7   :  { %v93_v31 = vadd.f32 %v150_v28, %v92_v29  ;;  %v180_v32 = vpop.f32.mrb[1].mxu0 }
  0xf8   :  { %v95_v33 = vpop.f32.mrb[2].mxu0 }
  0xf9   :  { %v96_v34 = vadd.f32 %v150_v28, %v95_v33  ;;  %v181_v35 = vpop.f32.mrb[3].mxu0  ;;  %v101_v36 = vadd.f32 %v99_v30, %v93_v31 }
  0xfb   :  { %103 = vadd.xlane.f32.xlu0 %v101_v36  ;;  %v102_v38 = vadd.f32 %v100_v37, %v96_v34 }
  0xff   :  { %105 = vadd.xlane.f32.xlu0 %v102_v38 }
 0x188   :  { %v104_v39 = vpop.xlane.xlu0 %103 }
 0x189   :  { %v108_v40 = vmul.f32 0.0078125, %v104_v39 }
 0x18b   :  { %v110_v41 = vsub.f32 %v101_v36, %v108_v40 }
 0x18c   :  { %v106_v42 = vpop.xlane.xlu0 %105 }
 0x18d   :  { %v109_v43 = vmul.f32 0.0078125, %v106_v42  ;;  %v112_v44 = vmul.f32 %v110_v41, %v110_v41 }
 0x18f   :  { %v111_v45 = vsub.f32 %v102_v38, %v109_v43  ;;  %114 = vadd.xlane.f32.xlu1 %v112_v44 }
 0x191   :  { %v113_v46 = vmul.f32 %v111_v45, %v111_v45 }
 0x193   :  { %116 = vadd.xlane.f32.xlu1 %v113_v46 }
 0x21c   :  { %v115_v47 = vpop.xlane.xlu1 %114 }
 0x21d   :  { %v118_v48 = vmul.f32 0.0078125, %v115_v47 }
 0x21f   :  { %v120_v49 = vadd.f32 1e-12, %v118_v48 }
 0x220   :  { %v117_v50 = vpop.xlane.xlu1 %116 }
 0x221   :  { %184 = vrsqrt.f32 %v120_v49  ;;  %v119_v51 = vmul.f32 0.0078125, %v117_v50 }
 0x223   :  { %v121_v52 = vadd.f32 1e-12, %v119_v51 }
 0x225   :  { %186 = vrsqrt.f32 %v121_v52 }
 0x22b   :  { %v185_v53 = vpop.eup %184 }
 0x22c   :  { %v124_v55 = vmul.f32 %v185_v53, %v110_v41 }
 0x22e   :  { %v133_v57 = vmul.f32 %v151_v54, %v124_v55 }
 0x22f   :  { %v187_v58 = vpop.eup %186 }
 0x230   :  { %v142_v59 = vadd.f32 %v152_v56, %v133_v57  ;;  %v125_v60 = vmul.f32 %v187_v58, %v111_v45 }
 0x232   :  { %144 = vst [vmem:[%s306_s6] sm:$0xff] %v142_v59  ;;  %v134_v61 = vmul.f32 %v151_v54, %v125_v60 }
 0x234   :  { %v143_v62 = vadd.f32 %v152_v56, %v134_v61 }
 0x236   :  { %145 = vst [vmem:[%s306_s6 + $0x8] sm:$0xff] %v143_v62 }

// kernel: _lambda_.18
= control target key start
LH: loop header
LB: loop body
LE: loop exit
PB: predicated region body
PF: predicated region fallthrough
CT: control target
= control target key end

     0   :  { %v233_v0 = vmov 0.0   ;;  %vm234_vm0 = vmmov 0   ;;  %v235_v8 = vmov 0   ;;  %s436_s1 = inlined_call_operand.vmem [shape: f32[128,384], index: 1, kind: input, shape index: {}]   ;;  %s437_s0 = inlined_call_operand.vmem [shape: f32[16,128], index: 0, kind: input, shape index: {}]   ;;  %s438_s2 = inlined_call_operand.vmem [shape: f32[1,384], index: 2, kind: input, shape index: {}]   ;;  %s439_s3 = inlined_call_operand.vmem [shape: f32[16,384], index: 3, kind: output, shape index: {}]  }
   0x1   :  { %210 = vmatprep.subr.bf16.mxu1 %v233_v0  ;;  %v18_v1 = vld [vmem:[%s436_s1 + $0x8] sm:$0xff]  ;;  %v21_v2 = vld [vmem:[%s436_s1 + $0x20] sm:$0xff]  ;;  %v19_v3 = vld [vmem:[%s436_s1 + $0x10] sm:$0xff]  ;;  %226 = vmatprep.mubr.msk.bf16.mxu1 %vm234_vm0, %v233_v0 }
   0x2   :  { %v67_v4 = vpack.c.bf16 %v21_v2, %v18_v1  ;;  %v22_v5 = vld [vmem:[%s436_s1 + $0x28] sm:$0xff]  ;;  %v17_v6 = vld [vmem:[%s436_s1] sm:$0xff]  ;;  %v20_v7 = vld [vmem:[%s436_s1 + $0x18] sm:$0xff]  ;;  %139 = vmatprep.mubr.bf16.mxu0 %v235_v8 }
   0x3   :  { %v68_v9 = vpack.c.bf16 %v22_v5, %v19_v3  ;;  %v66_v10 = vpack.c.bf16 %v20_v7, %v17_v6  ;;  %v24_v11 = vld [vmem:[%s436_s1 + $0x38] sm:$0xff]  ;;  %v27_v12 = vld [vmem:[%s436_s1 + $0x50] sm:$0xff]  ;;  %v25_v13 = vld [vmem:[%s436_s1 + $0x40] sm:$0xff] }
   0x4   :  { %107 = vmatprep.subr.bf16.mxu0 %v67_v4  ;;  %v70_v14 = vpack.c.bf16 %v27_v12, %v24_v11  ;;  %v28_v15 = vld [vmem:[%s436_s1 + $0x58] sm:$0xff]  ;;  %v23_v16 = vld [vmem:[%s436_s1 + $0x30] sm:$0xff]  ;;  %v26_v17 = vld [vmem:[%s436_s1 + $0x48] sm:$0xff] }
   0x5   :  { %211 = vmatpush3.bf16.msra.mxu1 %v68_v9  ;;  %108 = vmatpush1.bf16.msra.mxu0 %v66_v10  ;;  %v71_v18 = vpack.c.bf16 %v28_v15, %v25_v13  ;;  %v69_v19 = vpack.c.bf16 %v26_v17, %v23_v16  ;;  %v30_v20 = vld [vmem:[%s436_s1 + $0x68] sm:$0xff]  ;;  %v33_v21 = vld [vmem:[%s436_s1 + $0x80] sm:$0xff]  ;;  %v31_v22 = vld [vmem:[%s436_s1 + $0x70] sm:$0xff] }
   0x6   :  { %212 = vmatprep.subr.bf16.mxu1 %v233_v0  ;;  %109 = vmatprep.subr.bf16.mxu0 %v70_v14  ;;  %v73_v23 = vpack.c.bf16 %v33_v21, %v30_v20  ;;  %v34_v24 = vld [vmem:[%s436_s1 + $0x88] sm:$0xff]  ;;  %v29_v25 = vld [vmem:[%s436_s1 + $0x60] sm:$0xff]  ;;  %v32_v26 = vld [vmem:[%s436_s1 + $0x78] sm:$0xff]  ;;  %v92_v14 = vlaneseq }
   0x7   :  { %v36_v27 = vld [vmem:[%s436_s1 + $0x98] sm:$0xff]  ;;  %v39_v28 = vld [vmem:[%s436_s1 + $0xb0] sm:$0xff]  ;;  %v74_v29 = vpack.c.bf16 %v34_v24, %v31_v22  ;;  %v72_v30 = vpack.c.bf16 %v32_v26, %v29_v25  ;;  %v37_v31 = vld [vmem:[%s436_s1 + $0xa0] sm:$0xff] }
   0x8   :  { %v76_v32 = vpack.c.bf16 %v39_v28, %v36_v27  ;;  %v40_v33 = vld [vmem:[%s436_s1 + $0xb8] sm:$0xff]  ;;  %v35_v34 = vld [vmem:[%s436_s1 + $0x90] sm:$0xff]  ;;  %v38_v35 = vld [vmem:[%s436_s1 + $0xa8] sm:$0xff]  ;;  %v93_v15 = vshrl.u32 %v92_v14, 7 }
   0x9   :  { %213 = vmatpush3.bf16.msra.mxu1 %v71_v18  ;;  %110 = vmatpush1.bf16.msra.mxu0 %v69_v19  ;;  %v42_v36 = vld [vmem:[%s436_s1 + $0xc8] sm:$0xff]  ;;  %v45_v37 = vld [vmem:[%s436_s1 + $0xe0] sm:$0xff]  ;;  %v77_v38 = vpack.c.bf16 %v40_v33, %v37_v31  ;;  %v75_v39 = vpack.c.bf16 %v38_v35, %v35_v34  ;;  %v43_v40 = vld [vmem:[%s436_s1 + $0xd0] sm:$0xff] }
   0xa   :  { %214 = vmatprep.subr.bf16.mxu1 %v233_v0  ;;  %111 = vmatprep.subr.bf16.mxu0 %v73_v23  ;;  %v79_v41 = vpack.c.bf16 %v45_v37, %v42_v36  ;;  %v46_v42 = vld [vmem:[%s436_s1 + $0xe8] sm:$0xff]  ;;  %v41_v43 = vld [vmem:[%s436_s1 + $0xc0] sm:$0xff]  ;;  %v44_v44 = vld [vmem:[%s436_s1 + $0xd8] sm:$0xff]  ;;  %v102_v16 = vsub.s32 2, %v93_v15  ;;  %v94_v17 = vsub.s32 0, %v93_v15  ;;  %v98_v19 = vsub.s32 1, %v93_v15 }
   0xb   :  { %v48_v45 = vld [vmem:[%s436_s1 + $0xf8] sm:$0xff]  ;;  %v51_v46 = vld [vmem:[%s436_s1 + $0x110] sm:$0xff]  ;;  %v80_v47 = vpack.c.bf16 %v46_v42, %v43_v40  ;;  %v78_v48 = vpack.c.bf16 %v44_v44, %v41_v43  ;;  %v49_v49 = vld [vmem:[%s436_s1 + $0x100] sm:$0xff] }
   0xc   :  { %v82_v50 = vpack.c.bf16 %v51_v46, %v48_v45  ;;  %v52_v51 = vld [vmem:[%s436_s1 + $0x118] sm:$0xff]  ;;  %v47_v52 = vld [vmem:[%s436_s1 + $0xf0] sm:$0xff]  ;;  %v50_v53 = vld [vmem:[%s436_s1 + $0x108] sm:$0xff] }
   0xd   :  { %215 = vmatpush3.bf16.msra.mxu1 %v74_v29  ;;  %112 = vmatpush1.bf16.msra.mxu0 %v72_v30  ;;  %v54_v54 = vld [vmem:[%s436_s1 + $0x128] sm:$0xff]  ;;  %v57_v55 = vld [vmem:[%s436_s1 + $0x140] sm:$0xff]  ;;  %v83_v56 = vpack.c.bf16 %v52_v51, %v49_v49  ;;  %v81_v57 = vpack.c.bf16 %v50_v53, %v47_v52  ;;  %v55_v58 = vld [vmem:[%s436_s1 + $0x130] sm:$0xff] }
   0xe   :  { %216 = vmatprep.subr.bf16.mxu1 %v233_v0  ;;  %113 = vmatprep.subr.bf16.mxu0 %v76_v32  ;;  %v85_v59 = vpack.c.bf16 %v57_v55, %v54_v54  ;;  %v58_v60 = vld [vmem:[%s436_s1 + $0x148] sm:$0xff]  ;;  %v53_v61 = vld [vmem:[%s436_s1 + $0x120] sm:$0xff]  ;;  %v56_v62 = vld [vmem:[%s436_s1 + $0x138] sm:$0xff] }
   0xf   :  { %v60_v63 = vld [vmem:[%s436_s1 + $0x158] sm:$0xff]  ;;  %v63_v1 = vld [vmem:[%s436_s1 + $0x170] sm:$0xff]  ;;  %v86_v2 = vpack.c.bf16 %v58_v60, %v55_v58  ;;  %v84_v3 = vpack.c.bf16 %v56_v62, %v53_v61  ;;  %v61_v4 = vld [vmem:[%s436_s1 + $0x160] sm:$0xff] }
  0x10   :  { %v88_v5 = vpack.c.bf16 %v63_v1, %v60_v63  ;;  %v64_v6 = vld [vmem:[%s436_s1 + $0x178] sm:$0xff]  ;;  %v59_v7 = vld [vmem:[%s436_s1 + $0x150] sm:$0xff]  ;;  %v62_v8 = vld [vmem:[%s436_s1 + $0x168] sm:$0xff] }
  0x11   :  { %217 = vmatpush3.bf16.msra.mxu1 %v77_v38  ;;  %114 = vmatpush1.bf16.msra.mxu0 %v75_v39  ;;  %v89_v9 = vpack.c.bf16 %v64_v6, %v61_v4  ;;  %v87_v10 = vpack.c.bf16 %v62_v8, %v59_v7  ;;  %v15_v11 = vld [vmem:[%s437_s0] sm:$0xff]  ;;  %v16_v12 = vld [vmem:[%s437_s0 + $0x8] sm:$0xff] }
  0x12   :  { %218 = vmatprep.subr.bf16.mxu1 %v233_v0  ;;  %115 = vmatprep.subr.bf16.mxu0 %v79_v41  ;;  %v65_v13 = vpack.c.bf16 %v16_v12, %v15_v11  ;;  %v90_v18 = vld [vmem:[%s438_s2] sm:$0x7] }
  0x13   :  { %v103_v20 = vrot.slane %v90_v18, %v102_v16  ;;  %v95_v21 = vrot.slane %v90_v18, %v94_v17  ;;  %v99_v22 = vrot.slane %v90_v18, %v98_v19 }
  0x15   :  { %219 = vmatpush3.bf16.msra.mxu1 %v80_v47  ;;  %116 = vmatpush1.bf16.msra.mxu0 %v78_v48 }
  0x16   :  { %220 = vmatprep.subr.bf16.mxu1 %v233_v0  ;;  %117 = vmatprep.subr.bf16.mxu0 %v82_v50 }
  0x19   :  { %221 = vmatpush3.bf16.msra.mxu1 %v83_v56  ;;  %118 = vmatpush1.bf16.msra.mxu0 %v81_v57 }
  0x1a   :  { %222 = vmatprep.subr.bf16.mxu1 %v233_v0  ;;  %119 = vmatprep.subr.bf16.mxu0 %v85_v59 }
  0x1d   :  { %223 = vmatpush3.bf16.msra.mxu1 %v86_v2  ;;  %120 = vmatpush1.bf16.msra.mxu0 %v84_v3 }
  0x1e   :  { %224 = vmatprep.subr.bf16.mxu1 %v233_v0  ;;  %121 = vmatprep.subr.bf16.mxu0 %v88_v5 }
  0x21   :  { %225 = vmatpush3.bf16.msra.mxu1 %v89_v9  ;;  %122 = vmatpush1.bf16.msra.mxu0 %v87_v10 }
  0x24   :  { %227 = vmatmul.mubr.bf16.vlgmr.msra.gmra.mrb[0].mxu1 %v65_v13  ;;  %140 = vmatmul.mubr.bf16.vlgmr.msra.gmra.mrb[0].mxu0 %v65_v13 }
  0xf7   :  { %v184_v23 = vpop.f32.mrb[0].mxu1  ;;  %v141_v0 = vpop.f32.mrb[0].mxu0 }
  0xf8   :  { %v185_v24 = vadd.f32 %v184_v23, %v103_v20  ;;  %v142_v25 = vadd.f32 %v141_v0, %v95_v21  ;;  %v228_v26 = vpop.f32.mrb[1].mxu1  ;;  %v143_v27 = vpop.f32.mrb[1].mxu0 }
  0xf9   :  { %v144_v28 = vadd.f32 %v143_v27, %v99_v22  ;;  %v187_v29 = vpop.f32.mrb[2].mxu1  ;;  %v145_v30 = vpop.f32.mrb[2].mxu0 }
  0xfa   :  { %193 = vst [vmem:[%s439_s3 + $0x10] sm:$0xff] %v185_v24  ;;  %191 = vst [vmem:[%s439_s3] sm:$0xff] %v142_v25  ;;  %v188_v31 = vadd.f32 %v187_v29, %v103_v20  ;;  %v146_v32 = vadd.f32 %v145_v30, %v95_v21  ;;  %v229_v33 = vpop.f32.mrb[3].mxu1  ;;  %v147_v34 = vpop.f32.mrb[3].mxu0 }
  0xfb   :  { %192 = vst [vmem:[%s439_s3 + $0x8] sm:$0xff] %v144_v28  ;;  %v148_v35 = vadd.f32 %v147_v34, %v99_v22 }
  0xfc   :  { %196 = vst [vmem:[%s439_s3 + $0x28] sm:$0xff] %v188_v31  ;;  %194 = vst [vmem:[%s439_s3 + $0x18] sm:$0xff] %v146_v32 }
  0xfd   :  { %195 = vst [vmem:[%s439_s3 + $0x20] sm:$0xff] %v148_v35 }

// kernel: _lambda_.23
= control target key start
LH: loop header
LB: loop body
LE: loop exit
PB: predicated region body
PF: predicated region fallthrough
CT: control target
= control target key end

     0   :  { %v212_v7 = vmov 0   ;;  %s353_s0 = inlined_call_operand.vmem [shape: f32[16,128], index: 0, kind: input, shape index: {}]   ;;  %s354_s1 = inlined_call_operand.vmem [shape: f32[128,256], index: 1, kind: input, shape index: {}]   ;;  %s355_s2 = inlined_call_operand.vmem [shape: f32[1,256], index: 2, kind: input, shape index: {}]   ;;  %s356_s3 = inlined_call_operand.hbm [shape: f32[16,256], index: 3, kind: output, shape index: {}]  }
   0x1   :  { %v19_v0 = vld [vmem:[%s354_s1 + $0x8] sm:$0xff]  ;;  %v21_v1 = vld [vmem:[%s354_s1 + $0x18] sm:$0xff]  ;;  %v18_v2 = vld [vmem:[%s354_s1] sm:$0xff]  ;;  %111 = vmatprep.mubr.bf16.mxu0 %v212_v7 }
   0x2   :  { %v52_v3 = vpack.c.bf16 %v21_v1, %v19_v0  ;;  %v20_v4 = vld [vmem:[%s354_s1 + $0x10] sm:$0xff]  ;;  %v23_v5 = vld [vmem:[%s354_s1 + $0x28] sm:$0xff]  ;;  %v25_v6 = vld [vmem:[%s354_s1 + $0x38] sm:$0xff] }
   0x3   :  { %v51_v8 = vpack.c.bf16 %v20_v4, %v18_v2  ;;  %v54_v9 = vpack.c.bf16 %v25_v6, %v23_v5  ;;  %v22_v10 = vld [vmem:[%s354_s1 + $0x20] sm:$0xff]  ;;  %v24_v11 = vld [vmem:[%s354_s1 + $0x30] sm:$0xff]  ;;  %v27_v12 = vld [vmem:[%s354_s1 + $0x48] sm:$0xff] }
   0x4   :  { %79 = vmatprep.subr.bf16.mxu0 %v52_v3  ;;  %v29_v13 = vld [vmem:[%s354_s1 + $0x58] sm:$0xff]  ;;  %v53_v14 = vpack.c.bf16 %v24_v11, %v22_v10  ;;  %v26_v16 = vld [vmem:[%s354_s1 + $0x40] sm:$0xff]  ;;  %v28_v17 = vld [vmem:[%s354_s1 + $0x50] sm:$0xff] }
   0x5   :  { %80 = vmatpush1.bf16.msra.mxu0 %v51_v8  ;;  %v56_v15 = vpack.c.bf16 %v29_v13, %v27_v12  ;;  %v31_v18 = vld [vmem:[%s354_s1 + $0x68] sm:$0xff]  ;;  %v33_v19 = vld [vmem:[%s354_s1 + $0x78] sm:$0xff]  ;;  %v55_v20 = vpack.c.bf16 %v28_v17, %v26_v16  ;;  %v30_v22 = vld [vmem:[%s354_s1 + $0x60] sm:$0xff] }
   0x6   :  { %81 = vmatprep.subr.bf16.mxu0 %v54_v9  ;;  %v58_v21 = vpack.c.bf16 %v33_v19, %v31_v18  ;;  %v32_v23 = vld [vmem:[%s354_s1 + $0x70] sm:$0xff]  ;;  %v35_v24 = vld [vmem:[%s354_s1 + $0x88] sm:$0xff]  ;;  %v37_v25 = vld [vmem:[%s354_s1 + $0x98] sm:$0xff] }
   0x9   :  { %82 = vmatpush1.bf16.msra.mxu0 %v53_v14 }
   0xa   :  { %83 = vmatprep.subr.bf16.mxu0 %v56_v15 }
   0xb   :  { %8 = vsyncpa [#allocation3], 0  ;;  %v57_v26 = vpack.c.bf16 %v32_v23, %v30_v22  ;;  %v60_v27 = vpack.c.bf16 %v37_v25, %v35_v24  ;;  %v34_v28 = vld [vmem:[%s354_s1 + $0x80] sm:$0xff]  ;;  %v36_v29 = vld [vmem:[%s354_s1 + $0x90] sm:$0xff]  ;;  %v69_v52 = vlaneseq }
   0xc   :  { %v39_v30 = vld [vmem:[%s354_s1 + $0xa8] sm:$0xff]  ;;  %v41_v31 = vld [vmem:[%s354_s1 + $0xb8] sm:$0xff]  ;;  %v59_v32 = vpack.c.bf16 %v36_v29, %v34_v28  ;;  %v38_v34 = vld [vmem:[%s354_s1 + $0xa0] sm:$0xff] }
   0xd   :  { %84 = vmatpush1.bf16.msra.mxu0 %v55_v20  ;;  %v62_v33 = vpack.c.bf16 %v41_v31, %v39_v30  ;;  %v40_v35 = vld [vmem:[%s354_s1 + $0xb0] sm:$0xff]  ;;  %v43_v36 = vld [vmem:[%s354_s1 + $0xc8] sm:$0xff]  ;;  %v45_v37 = vld [vmem:[%s354_s1 + $0xd8] sm:$0xff]  ;;  %v70_v53 = vshrl.u32 %v69_v52, 7 }
   0xe   :  { %85 = vmatprep.subr.bf16.mxu0 %v58_v21  ;;  %v61_v38 = vpack.c.bf16 %v40_v35, %v38_v34  ;;  %v64_v39 = vpack.c.bf16 %v45_v37, %v43_v36  ;;  %v42_v40 = vld [vmem:[%s354_s1 + $0xc0] sm:$0xff]  ;;  %v44_v41 = vld [vmem:[%s354_s1 + $0xd0] sm:$0xff]  ;;  %v47_v42 = vld [vmem:[%s354_s1 + $0xe8] sm:$0xff] }
   0xf   :  { %v49_v43 = vld [vmem:[%s354_s1 + $0xf8] sm:$0xff]  ;;  %v63_v44 = vpack.c.bf16 %v44_v41, %v42_v40  ;;  %v46_v46 = vld [vmem:[%s354_s1 + $0xe0] sm:$0xff]  ;;  %v48_v47 = vld [vmem:[%s354_s1 + $0xf0] sm:$0xff]  ;;  %v71_v54 = vsub.s32 0, %v70_v53  ;;  %v75_v56 = vsub.s32 1, %v70_v53 }
  0x10   :  { %v66_v45 = vpack.c.bf16 %v49_v43, %v47_v42  ;;  %v65_v48 = vpack.c.bf16 %v48_v47, %v46_v46  ;;  %v16_v49 = vld [vmem:[%s353_s0] sm:$0xff]  ;;  %v17_v50 = vld [vmem:[%s353_s0 + $0x8] sm:$0xff]  ;;  %s213_s0 = smov [#allocation2]  }
  0x11   :  { %86 = vmatpush1.bf16.msra.mxu0 %v57_v26  ;;  %v50_v51 = vpack.c.bf16 %v17_v50, %v16_v49  ;;  %v67_v55 = vld [vmem:[%s355_s2] sm:$0x3]  ;;  %s161_s1 = sshll.u32 %s213_s0, 4  ;;  %s162_s1 = int_to_ptr.vmem [resolvable:$true] %s161_s1 }
  0x12   :  { %87 = vmatprep.subr.bf16.mxu0 %v60_v27  ;;  %v72_v57 = vrot.slane %v67_v55, %v71_v54  ;;  %v76_v58 = vrot.slane %v67_v55, %v75_v56  ;;  %s188_s2 = scalar_lea.vmem %s162_s1, 512  ;;  %p193_p1 = scmp.lt.s32.totalorder %s162_s1, %s162_s1 }
  0x13   :  { %p189_p0 = scmp.ne.s32.totalorder %s162_s1, %s188_s2  ;;  %p194_p2 = scmp.lt.s32.totalorder %s188_s2, %s188_s2 }
  0x15   :  { %88 = vmatpush1.bf16.msra.mxu0 %v59_v32  ;;  %p195_p3 = por %p194_p2, %p193_p1 }
  0x16   :  { %89 = vmatprep.subr.bf16.mxu0 %v62_v33 }
  0x17   :  { %p196_p4 = pnand %p195_p3, %p189_p0 }
  0x19   :  { %90 = vmatpush1.bf16.msra.mxu0 %v61_v38 }
  0x1a   :  { %91 = vmatprep.subr.bf16.mxu0 %v64_v39 }
  0x1d   :  { %92 = vmatpush1.bf16.msra.mxu0 %v63_v44 }
  0x1e   :  { %93 = vmatprep.subr.bf16.mxu0 %v66_v45 }
  0x21   :  { %94 = vmatpush1.bf16.msra.mxu0 %v65_v48 }
  0x24   :  { %112 = vmatmul.mubr.bf16.vlgmr.msra.gmra.mrb[0].mxu0 %v50_v51 }
  0xf7   :  { %v113_v59 = vpop.f32.mrb[0].mxu0 }
  0xf8   :  { %v114_v60 = vadd.f32 %v113_v59, %v72_v57  ;;  %v115_v61 = vpop.f32.mrb[1].mxu0 }
  0xf9   :  { %v116_v62 = vadd.f32 %v115_v61, %v76_v58  ;;  %v117_v63 = vpop.f32.mrb[2].mxu0 }
  0xfa   :  { %v119_v0 = vpop.f32.mrb[3].mxu0  ;;  %v118_v1 = vadd.f32 %v117_v63, %v72_v57 }
  0xfb   :  { %v120_v2 = vadd.f32 %v119_v0, %v76_v58  ;;  %v122_v3 = vmax.f32 %v114_v60, %v116_v62 }
  0xfd   :  { %123 = vmax.xlane.f32.xlu0 %v122_v3  ;;  %v125_v4 = vmax.f32 %v118_v1, %v120_v2 }
 0x101   :  { %126 = vmax.xlane.f32.xlu0 %v125_v4 }
 0x18a   :  { %v124_v5 = vpop.xlane.xlu0 %123 }
 0x18b   :  { %v128_v6 = vsub.f32 %v114_v60, %v124_v5  ;;  %v129_v7 = vsub.f32 %v116_v62, %v124_v5 }
 0x18d   :  { %v132_v8 = vmul.f32 1.442695, %v128_v6  ;;  %v134_v9 = vmul.f32 1.442695, %v129_v7 }
 0x18e   :  { %v127_v10 = vpop.xlane.xlu0 %126 }
 0x18f   :  { %176 = vpow2.f32 %v132_v8  ;;  %v130_v11 = vsub.f32 %v118_v1, %v127_v10  ;;  %v131_v12 = vsub.f32 %v120_v2, %v127_v10 }
 0x190   :  { %178 = vpow2.f32 %v134_v9 }
 0x191   :  { %v136_v13 = vmul.f32 1.442695, %v130_v11  ;;  %v138_v14 = vmul.f32 1.442695, %v131_v12 }
 0x193   :  { %180 = vpow2.f32 %v136_v13 }
 0x194   :  { %182 = vpow2.f32 %v138_v14 }
 0x199   :  { %v177_v15 = vpop.eup %176 }
 0x19a   :  { %v179_v16 = vpop.eup %178 }
 0x19b   :  { %v140_v17 = vadd.f32 %v179_v16, %v177_v15 }
 0x19d   :  { %v181_v18 = vpop.eup %180  ;;  %141 = vadd.xlane.f32.xlu1 %v140_v17 }
 0x19e   :  { %v183_v19 = vpop.eup %182 }
 0x19f   :  { %v143_v20 = vadd.f32 %v183_v19, %v181_v18 }
 0x1a1   :  { %144 = vadd.xlane.f32.xlu1 %v143_v20 }
 0x22a   :  { %v142_v21 = vpop.xlane.xlu1 %141 }
 0x22b   :  { %184 = vrcp.f32 %v142_v21 }
 0x22e   :  { %v145_v22 = vpop.xlane.xlu1 %144 }
 0x22f   :  { %186 = vrcp.f32 %v145_v22 }
 0x235   :  { %v185_v23 = vpop.eup %184 }
 0x236   :  { %v148_v24 = vmul.f32 %v185_v23, %v177_v15  ;;  %v149_v25 = vmul.f32 %v185_v23, %v179_v16 }
 0x238   :  { %152 = vst [vmem:[#allocation2] sm:$0xff] %v148_v24  ;;  %153 = vst [vmem:[#allocation2 + $0x8] sm:$0xff] %v149_v25 }
 0x239   :  { %v187_v26 = vpop.eup %186 }
 0x23a   :  { %v150_v27 = vmul.f32 %v187_v26, %v181_v18  ;;  %v151_v28 = vmul.f32 %v187_v26, %v183_v19 }
 0x23c   :  { %154 = vst [vmem:[#allocation2 + $0x10] sm:$0xff] %v150_v27  ;;  %155 = vst [vmem:[#allocation2 + $0x18] sm:$0xff] %v151_v28 }
 0x23d   :  { %199 = shalt.err (!%p196_p4)
}
 0x23e   :  { %s200_s30 = scalar_lea.hbm %s356_s3, 512 }
 0x23f   :  { %p201_p5 = scmp.ne.s32.totalorder %s356_s3, %s200_s30  ;;  %p204_p6 = scmp.lt.u32.totalorder %s200_s30, %s356_s3 }
 0x241   :  { %p206_p7 = pnand %p204_p6, %p201_p5 }
 0x243   :  { %209 = shalt.err (!%p206_p7)
}
 0x244   :  { %s214_s8 = smov 256   ;;  %s215_s9 = smov 16  }
 0x245   :  { %167 = dma.vmem_to_hbm [thread:$0]  %s162_s1, 512, %s356_s3, [#allocation3], %s214_s8, %s214_s8, %s215_s9  }
 0x246   :  { %210 = dma.done.wait [#allocation3], 512  }
 0x247   :  { %211 = vsyncadd [#allocation3], 4294966784 }
 0x248   :  { %171 = vsyncpa [#allocation3], 1 }

// kernel: _lambda_.17
= control target key start
LH: loop header
LB: loop body
LE: loop exit
PB: predicated region body
PF: predicated region fallthrough
CT: control target
= control target key end

     0   :  { %s595_s1 = inlined_call_operand.vmem [shape: f32[512,128], index: 1, kind: input, shape index: {}]   ;;  %s596_s0 = inlined_call_operand.vmem [shape: f32[16,512], index: 0, kind: input, shape index: {}]   ;;  %s597_s2 = inlined_call_operand.vmem [shape: f32[1,128], index: 2, kind: input, shape index: {}]   ;;  %s598_s3 = inlined_call_operand.vmem [shape: f32[16,128], index: 3, kind: input, shape index: {}]   ;;  %s599_s4 = inlined_call_operand.vmem [shape: f32[1,128], index: 4, kind: input, shape index: {}]   ;;  %s600_s5 = inlined_call_operand.vmem [shape: f32[1,128], index: 5, kind: input, shape index: {}]   ;;  %s601_s6 = inlined_call_operand.vmem [shape: f32[16,128], index: 6, kind: output, shape index: {}]  }
   0x1   :  { %v48_v0 = vld [vmem:[%s595_s1 + $0x80] sm:$0xff]  ;;  %v49_v1 = vld [vmem:[%s595_s1 + $0x88] sm:$0xff]  ;;  %v50_v11 = vld [vmem:[%s595_s1 + $0x90] sm:$0xff] }
   0x2   :  { %v80_v2 = vld [vmem:[%s595_s1 + $0x180] sm:$0xff]  ;;  %v108_v3 = vpack.c.bf16 %v49_v1, %v48_v0  ;;  %v81_v4 = vld [vmem:[%s595_s1 + $0x188] sm:$0xff]  ;;  %v51_v13 = vld [vmem:[%s595_s1 + $0x98] sm:$0xff] }
   0x3   :  { %v32_v5 = vld [vmem:[%s595_s1] sm:$0xff]  ;;  %v33_v6 = vld [vmem:[%s595_s1 + $0x8] sm:$0xff]  ;;  %v124_v7 = vpack.c.bf16 %v81_v4, %v80_v2  ;;  %v82_v14 = vld [vmem:[%s595_s1 + $0x190] sm:$0xff]  ;;  %v109_v16 = vpack.c.bf16 %v51_v13, %v50_v11 }
   0x4   :  { %v100_v8 = vpack.c.bf16 %v33_v6, %v32_v5  ;;  %v64_v9 = vld [vmem:[%s595_s1 + $0x100] sm:$0xff]  ;;  %v65_v10 = vld [vmem:[%s595_s1 + $0x108] sm:$0xff]  ;;  %275 = vmatprep.subr.bf16.mxu0 %v108_v3  ;;  %v83_v15 = vld [vmem:[%s595_s1 + $0x198] sm:$0xff] }
   0x5   :  { %v116_v12 = vpack.c.bf16 %v65_v10, %v64_v9  ;;  %297 = vmatprep.subr.bf16.mxu1 %v124_v7  ;;  %v125_v17 = vpack.c.bf16 %v83_v15, %v82_v14  ;;  %v34_v18 = vld [vmem:[%s595_s1 + $0x10] sm:$0xff]  ;;  %v35_v19 = vld [vmem:[%s595_s1 + $0x18] sm:$0xff]  ;;  %v52_v23 = vld [vmem:[%s595_s1 + $0xa0] sm:$0xff] }
   0x6   :  { %276 = vmatpush3.bf16.msra.mxu0 %v100_v8  ;;  %v66_v20 = vld [vmem:[%s595_s1 + $0x110] sm:$0xff]  ;;  %v101_v21 = vpack.c.bf16 %v35_v19, %v34_v18  ;;  %v67_v22 = vld [vmem:[%s595_s1 + $0x118] sm:$0xff]  ;;  %v53_v24 = vld [vmem:[%s595_s1 + $0xa8] sm:$0xff] }
   0x7   :  { %298 = vmatpush3.bf16.msra.mxu1 %v116_v12  ;;  %277 = vmatprep.subr.bf16.mxu0 %v109_v16  ;;  %v117_v25 = vpack.c.bf16 %v67_v22, %v66_v20  ;;  %v110_v26 = vpack.c.bf16 %v53_v24, %v52_v23  ;;  %v84_v27 = vld [vmem:[%s595_s1 + $0x1a0] sm:$0xff]  ;;  %v85_v28 = vld [vmem:[%s595_s1 + $0x1a8] sm:$0xff]  ;;  %v54_v35 = vld [vmem:[%s595_s1 + $0xb0] sm:$0xff] }
   0x8   :  { %299 = vmatprep.subr.bf16.mxu1 %v125_v17  ;;  %v36_v29 = vld [vmem:[%s595_s1 + $0x20] sm:$0xff]  ;;  %v126_v30 = vpack.c.bf16 %v85_v28, %v84_v27  ;;  %v37_v31 = vld [vmem:[%s595_s1 + $0x28] sm:$0xff]  ;;  %v55_v36 = vld [vmem:[%s595_s1 + $0xb8] sm:$0xff] }
   0x9   :  { %v68_v32 = vld [vmem:[%s595_s1 + $0x120] sm:$0xff]  ;;  %v69_v33 = vld [vmem:[%s595_s1 + $0x128] sm:$0xff]  ;;  %v102_v34 = vpack.c.bf16 %v37_v31, %v36_v29  ;;  %v86_v37 = vld [vmem:[%s595_s1 + $0x1b0] sm:$0xff]  ;;  %v111_v39 = vpack.c.bf16 %v55_v36, %v54_v35 }
   0xa   :  { %278 = vmatpush3.bf16.msra.mxu0 %v101_v21  ;;  %v118_v38 = vpack.c.bf16 %v69_v33, %v68_v32  ;;  %v87_v40 = vld [vmem:[%s595_s1 + $0x1b8] sm:$0xff]  ;;  %v38_v41 = vld [vmem:[%s595_s1 + $0x30] sm:$0xff]  ;;  %v56_v46 = vld [vmem:[%s595_s1 + $0xc0] sm:$0xff] }
   0xb   :  { %300 = vmatpush3.bf16.msra.mxu1 %v117_v25  ;;  %279 = vmatprep.subr.bf16.mxu0 %v110_v26  ;;  %v39_v42 = vld [vmem:[%s595_s1 + $0x38] sm:$0xff]  ;;  %v127_v43 = vpack.c.bf16 %v87_v40, %v86_v37  ;;  %v70_v44 = vld [vmem:[%s595_s1 + $0x130] sm:$0xff]  ;;  %v57_v47 = vld [vmem:[%s595_s1 + $0xc8] sm:$0xff] }
   0xc   :  { %301 = vmatprep.subr.bf16.mxu1 %v126_v30  ;;  %v71_v45 = vld [vmem:[%s595_s1 + $0x138] sm:$0xff]  ;;  %v88_v48 = vld [vmem:[%s595_s1 + $0x1c0] sm:$0xff]  ;;  %v89_v49 = vld [vmem:[%s595_s1 + $0x1c8] sm:$0xff]  ;;  %v103_v50 = vpack.c.bf16 %v39_v42, %v38_v41  ;;  %v112_v52 = vpack.c.bf16 %v57_v47, %v56_v46 }
   0xd   :  { %v119_v51 = vpack.c.bf16 %v71_v45, %v70_v44  ;;  %v40_v53 = vld [vmem:[%s595_s1 + $0x40] sm:$0xff]  ;;  %v41_v54 = vld [vmem:[%s595_s1 + $0x48] sm:$0xff]  ;;  %v128_v56 = vpack.c.bf16 %v89_v49, %v88_v48  ;;  %v58_v58 = vld [vmem:[%s595_s1 + $0xd0] sm:$0xff] }
   0xe   :  { %280 = vmatpush3.bf16.msra.mxu0 %v102_v34  ;;  %v72_v55 = vld [vmem:[%s595_s1 + $0x140] sm:$0xff]  ;;  %v73_v57 = vld [vmem:[%s595_s1 + $0x148] sm:$0xff]  ;;  %v59_v59 = vld [vmem:[%s595_s1 + $0xd8] sm:$0xff]  ;;  %v104_v62 = vpack.c.bf16 %v41_v54, %v40_v53 }
   0xf   :  { %302 = vmatpush3.bf16.msra.mxu1 %v118_v38  ;;  %281 = vmatprep.subr.bf16.mxu0 %v111_v39  ;;  %v90_v60 = vld [vmem:[%s595_s1 + $0x1d0] sm:$0xff]  ;;  %v91_v61 = vld [vmem:[%s595_s1 + $0x1d8] sm:$0xff]  ;;  %v120_v63 = vpack.c.bf16 %v73_v57, %v72_v55  ;;  %v113_v0 = vpack.c.bf16 %v59_v59, %v58_v58  ;;  %v60_v6 = vld [vmem:[%s595_s1 + $0xe0] sm:$0xff] }
  0x10   :  { %303 = vmatprep.subr.bf16.mxu1 %v127_v43  ;;  %v42_v1 = vld [vmem:[%s595_s1 + $0x50] sm:$0xff]  ;;  %v43_v2 = vld [vmem:[%s595_s1 + $0x58] sm:$0xff]  ;;  %v129_v4 = vpack.c.bf16 %v91_v61, %v90_v60  ;;  %v61_v7 = vld [vmem:[%s595_s1 + $0xe8] sm:$0xff] }
  0x11   :  { %v74_v3 = vld [vmem:[%s595_s1 + $0x150] sm:$0xff]  ;;  %v75_v5 = vld [vmem:[%s595_s1 + $0x158] sm:$0xff]  ;;  %v92_v8 = vld [vmem:[%s595_s1 + $0x1e0] sm:$0xff]  ;;  %v105_v11 = vpack.c.bf16 %v43_v2, %v42_v1  ;;  %v114_v16 = vpack.c.bf16 %v61_v7, %v60_v6 }
  0x12   :  { %282 = vmatpush3.bf16.msra.mxu0 %v103_v50  ;;  %v93_v9 = vld [vmem:[%s595_s1 + $0x1e8] sm:$0xff]  ;;  %v44_v10 = vld [vmem:[%s595_s1 + $0x60] sm:$0xff]  ;;  %v121_v15 = vpack.c.bf16 %v75_v5, %v74_v3  ;;  %v62_v17 = vld [vmem:[%s595_s1 + $0xf0] sm:$0xff] }
  0x13   :  { %304 = vmatpush3.bf16.msra.mxu1 %v119_v51  ;;  %283 = vmatprep.subr.bf16.mxu0 %v112_v52  ;;  %v45_v12 = vld [vmem:[%s595_s1 + $0x68] sm:$0xff]  ;;  %v76_v13 = vld [vmem:[%s595_s1 + $0x160] sm:$0xff]  ;;  %v130_v20 = vpack.c.bf16 %v93_v9, %v92_v8  ;;  %v63_v21 = vld [vmem:[%s595_s1 + $0xf8] sm:$0xff] }
  0x14   :  { %305 = vmatprep.subr.bf16.mxu1 %v128_v56  ;;  %v77_v14 = vld [vmem:[%s595_s1 + $0x168] sm:$0xff]  ;;  %v27_v23 = vld [vmem:[%s596_s0 + $0x18] sm:$0xff]  ;;  %v94_v25 = vld [vmem:[%s595_s1 + $0x1f0] sm:$0xff]  ;;  %v106_v28 = vpack.c.bf16 %v45_v12, %v44_v10  ;;  %v115_v30 = vpack.c.bf16 %v63_v21, %v62_v17 }
  0x15   :  { %v25_v18 = vld [vmem:[%s596_s0 + $0x8] sm:$0xff]  ;;  %v31_v24 = vld [vmem:[%s596_s0 + $0x38] sm:$0xff]  ;;  %v122_v29 = vpack.c.bf16 %v77_v14, %v76_v13  ;;  %v46_v31 = vld [vmem:[%s595_s1 + $0x70] sm:$0xff] }
  0x16   :  { %284 = vmatpush3.bf16.msra.mxu0 %v104_v62  ;;  %v29_v19 = vld [vmem:[%s596_s0 + $0x28] sm:$0xff]  ;;  %v95_v26 = vld [vmem:[%s595_s1 + $0x1f8] sm:$0xff]  ;;  %v99_v27 = vpack.c.bf16 %v31_v24, %v27_v23  ;;  %v78_v34 = vld [vmem:[%s595_s1 + $0x170] sm:$0xff] }
  0x17   :  { %306 = vmatpush3.bf16.msra.mxu1 %v120_v63  ;;  %285 = vmatprep.subr.bf16.mxu0 %v113_v0  ;;  %v97_v22 = vpack.c.bf16 %v29_v19, %v25_v18  ;;  %v47_v32 = vld [vmem:[%s595_s1 + $0x78] sm:$0xff]  ;;  %v131_v33 = vpack.c.bf16 %v95_v26, %v94_v25  ;;  %v24_v37 = vld [vmem:[%s596_s0] sm:$0xff]  ;;  %v26_v40 = vld [vmem:[%s596_s0 + $0x10] sm:$0xff] }
  0x18   :  { %307 = vmatprep.subr.bf16.mxu1 %v129_v4  ;;  %v79_v35 = vld [vmem:[%s595_s1 + $0x178] sm:$0xff]  ;;  %212 = vmatprep.mubr.bf16.mxu1 %v99_v27  ;;  %v107_v36 = vpack.c.bf16 %v47_v32, %v46_v31  ;;  %v28_v38 = vld [vmem:[%s596_s0 + $0x20] sm:$0xff]  ;;  %v30_v41 = vld [vmem:[%s596_s0 + $0x30] sm:$0xff] }
  0x19   :  { %171 = vmatprep.mubr.bf16.mxu0 %v97_v22  ;;  %v123_v39 = vpack.c.bf16 %v79_v35, %v78_v34  ;;  %v96_v42 = vpack.c.bf16 %v28_v38, %v24_v37  ;;  %v98_v43 = vpack.c.bf16 %v30_v41, %v26_v40  ;;  %v272_v46 = vld [vmem:[%s597_s2] ss:$0 sm:$0xff]  ;;  %v222_v63 = vld [vmem:[%s598_s3 + $0x8] sm:$0xff] }
  0x1a   :  { %286 = vmatpush3.bf16.msra.mxu0 %v105_v11  ;;  %v221_v58 = vld [vmem:[%s598_s3] sm:$0xff] }
  0x1b   :  { %308 = vmatpush3.bf16.msra.mxu1 %v121_v15  ;;  %287 = vmatprep.subr.bf16.mxu0 %v114_v16  ;;  %v273_v16 = vld [vmem:[%s599_s4] ss:$0 sm:$0xff] }
  0x1c   :  { %309 = vmatprep.subr.bf16.mxu1 %v130_v20  ;;  %v274_v18 = vld [vmem:[%s600_s5] ss:$0 sm:$0xff] }
  0x1e   :  { %288 = vmatpush3.bf16.msra.mxu0 %v106_v28 }
  0x1f   :  { %310 = vmatpush3.bf16.msra.mxu1 %v122_v29  ;;  %289 = vmatprep.subr.bf16.mxu0 %v115_v30 }
  0x20   :  { %311 = vmatprep.subr.bf16.mxu1 %v131_v33 }
  0x22   :  { %290 = vmatpush3.bf16.msra.mxu0 %v107_v36 }
  0x23   :  { %312 = vmatpush3.bf16.msra.mxu1 %v123_v39 }
  0x25   :  { %172 = vmatmul.mubr.bf16.vlgmr.msra.gmra.mrb[0].mxu0 %v96_v42 }
  0x26   :  { %213 = vmatmul.mubr.bf16.vlgmr.msra.gmra.mrb[0].mxu1 %v98_v43 }
  0xf8   :  { %v291_v44 = vpop.f32.mrb[0].mxu0 }
  0xf9   :  { %v313_v45 = vpop.f32.mrb[0].mxu1  ;;  %v292_v47 = vpop.f32.mrb[1].mxu0 }
  0xfa   :  { %v293_v48 = vadd.f32 %v292_v47, %v291_v44  ;;  %v314_v49 = vpop.f32.mrb[1].mxu1  ;;  %v294_v50 = vpop.f32.mrb[2].mxu0 }
  0xfb   :  { %v315_v51 = vadd.f32 %v314_v49, %v313_v45  ;;  %v316_v52 = vpop.f32.mrb[2].mxu1  ;;  %v295_v53 = vpop.f32.mrb[3].mxu0 }
  0xfc   :  { %v174_v54 = vadd.f32 %v293_v48, %v272_v46  ;;  %v296_v55 = vadd.f32 %v295_v53, %v294_v50  ;;  %v317_v56 = vpop.f32.mrb[3].mxu1 }
  0xfd   :  { %v318_v57 = vadd.f32 %v317_v56, %v316_v52 }
  0xfe   :  { %v215_v59 = vadd.f32 %v315_v51, %v174_v54  ;;  %v177_v60 = vadd.f32 %v296_v55, %v272_v46 }
 0x100   :  { %v218_v61 = vadd.f32 %v318_v57, %v177_v60  ;;  %v223_v62 = vadd.f32 %v221_v58, %v215_v59 }
 0x102   :  { %225 = vadd.xlane.f32.xlu0 %v223_v62  ;;  %v224_v0 = vadd.f32 %v222_v63, %v218_v61 }
 0x106   :  { %227 = vadd.xlane.f32.xlu0 %v224_v0 }
 0x18f   :  { %v226_v1 = vpop.xlane.xlu0 %225 }
 0x190   :  { %v230_v2 = vmul.f32 0.0078125, %v226_v1 }
 0x192   :  { %v232_v3 = vsub.f32 %v223_v62, %v230_v2 }
 0x193   :  { %v228_v4 = vpop.xlane.xlu0 %227 }
 0x194   :  { %v231_v5 = vmul.f32 0.0078125, %v228_v4  ;;  %v234_v6 = vmul.f32 %v232_v3, %v232_v3 }
 0x196   :  { %v233_v7 = vsub.f32 %v224_v0, %v231_v5  ;;  %236 = vadd.xlane.f32.xlu1 %v234_v6 }
 0x198   :  { %v235_v8 = vmul.f32 %v233_v7, %v233_v7 }
 0x19a   :  { %238 = vadd.xlane.f32.xlu1 %v235_v8 }
 0x223   :  { %v237_v9 = vpop.xlane.xlu1 %236 }
 0x224   :  { %v240_v10 = vmul.f32 0.0078125, %v237_v9 }
 0x226   :  { %v242_v11 = vadd.f32 1e-12, %v240_v10 }
 0x227   :  { %v239_v12 = vpop.xlane.xlu1 %238 }
 0x228   :  { %319 = vrsqrt.f32 %v242_v11  ;;  %v241_v13 = vmul.f32 0.0078125, %v239_v12 }
 0x22a   :  { %v243_v14 = vadd.f32 1e-12, %v241_v13 }
 0x22c   :  { %321 = vrsqrt.f32 %v243_v14 }
 0x232   :  { %v320_v15 = vpop.eup %319 }
 0x233   :  { %v246_v17 = vmul.f32 %v320_v15, %v232_v3 }
 0x235   :  { %v255_v19 = vmul.f32 %v273_v16, %v246_v17 }
 0x236   :  { %v322_v20 = vpop.eup %321 }
 0x237   :  { %v264_v21 = vadd.f32 %v274_v18, %v255_v19  ;;  %v247_v22 = vmul.f32 %v322_v20, %v233_v7 }
 0x239   :  { %266 = vst [vmem:[%s601_s6] sm:$0xff] %v264_v21  ;;  %v256_v23 = vmul.f32 %v273_v16, %v247_v22 }
 0x23b   :  { %v265_v24 = vadd.f32 %v274_v18, %v256_v23 }
 0x23d   :  { %267 = vst [vmem:[%s601_s6 + $0x8] sm:$0xff] %v265_v24 }

// kernel: _lambda_.16
= control target key start
LH: loop header
LB: loop body
LE: loop exit
PB: predicated region body
PF: predicated region fallthrough
CT: control target
= control target key end

     0   :  { %v323_v3 = vmov 0   ;;  %s625_s1 = inlined_call_operand.vmem [shape: f32[128,512], index: 1, kind: input, shape index: {}]   ;;  %s626_s0 = inlined_call_operand.vmem [shape: f32[16,128], index: 0, kind: input, shape index: {}]   ;;  %s627_s2 = inlined_call_operand.vmem [shape: f32[1,512], index: 2, kind: input, shape index: {}]   ;;  %s628_s3 = inlined_call_operand.vmem [shape: f32[16,512], index: 3, kind: output, shape index: {}]  }
   0x1   :  { %v18_v0 = vld [vmem:[%s625_s1 + $0x8] sm:$0xff]  ;;  %v20_v2 = vld [vmem:[%s625_s1 + $0x18] sm:$0xff]  ;;  %168 = vmatprep.mubr.bf16.mxu0 %v323_v3  ;;  %211 = vmatprep.mubr.bf16.mxu1 %v323_v3  ;;  %v17_v6 = vld [vmem:[%s625_s1] sm:$0xff] }
   0x2   :  { %v22_v1 = vld [vmem:[%s625_s1 + $0x28] sm:$0xff]  ;;  %v24_v5 = vld [vmem:[%s625_s1 + $0x38] sm:$0xff]  ;;  %v21_v7 = vld [vmem:[%s625_s1 + $0x20] sm:$0xff] }
   0x3   :  { %v83_v4 = vpack.c.bf16 %v22_v1, %v18_v0  ;;  %v85_v8 = vpack.c.bf16 %v24_v5, %v20_v2  ;;  %v82_v9 = vpack.c.bf16 %v21_v7, %v17_v6  ;;  %v19_v10 = vld [vmem:[%s625_s1 + $0x10] sm:$0xff]  ;;  %v26_v12 = vld [vmem:[%s625_s1 + $0x48] sm:$0xff]  ;;  %v28_v15 = vld [vmem:[%s625_s1 + $0x58] sm:$0xff] }
   0x4   :  { %v23_v11 = vld [vmem:[%s625_s1 + $0x30] sm:$0xff]  ;;  %v30_v14 = vld [vmem:[%s625_s1 + $0x68] sm:$0xff]  ;;  %v32_v16 = vld [vmem:[%s625_s1 + $0x78] sm:$0xff] }
   0x5   :  { %136 = vmatprep.subr.bf16.mxu0 %v83_v4  ;;  %v84_v13 = vpack.c.bf16 %v23_v11, %v19_v10  ;;  %179 = vmatprep.subr.bf16.mxu1 %v85_v8  ;;  %v87_v17 = vpack.c.bf16 %v30_v14, %v26_v12  ;;  %v89_v18 = vpack.c.bf16 %v32_v16, %v28_v15  ;;  %v25_v19 = vld [vmem:[%s625_s1 + $0x40] sm:$0xff]  ;;  %v27_v21 = vld [vmem:[%s625_s1 + $0x50] sm:$0xff]  ;;  %v34_v24 = vld [vmem:[%s625_s1 + $0x88] sm:$0xff] }
   0x6   :  { %137 = vmatpush1.bf16.msra.mxu0 %v82_v9  ;;  %v29_v20 = vld [vmem:[%s625_s1 + $0x60] sm:$0xff]  ;;  %v31_v23 = vld [vmem:[%s625_s1 + $0x70] sm:$0xff]  ;;  %v38_v25 = vld [vmem:[%s625_s1 + $0xa8] sm:$0xff] }
   0x7   :  { %180 = vmatpush1.bf16.msra.mxu1 %v84_v13  ;;  %v86_v22 = vpack.c.bf16 %v29_v20, %v25_v19  ;;  %138 = vmatprep.subr.bf16.mxu0 %v87_v17  ;;  %v88_v26 = vpack.c.bf16 %v31_v23, %v27_v21  ;;  %v91_v27 = vpack.c.bf16 %v38_v25, %v34_v24  ;;  %v36_v28 = vld [vmem:[%s625_s1 + $0x98] sm:$0xff]  ;;  %v33_v30 = vld [vmem:[%s625_s1 + $0x80] sm:$0xff]  ;;  %v35_v33 = vld [vmem:[%s625_s1 + $0x90] sm:$0xff] }
   0x8   :  { %181 = vmatprep.subr.bf16.mxu1 %v89_v18  ;;  %v40_v29 = vld [vmem:[%s625_s1 + $0xb8] sm:$0xff]  ;;  %v37_v32 = vld [vmem:[%s625_s1 + $0xa0] sm:$0xff]  ;;  %v39_v34 = vld [vmem:[%s625_s1 + $0xb0] sm:$0xff] }
   0x9   :  { %v93_v31 = vpack.c.bf16 %v40_v29, %v36_v28  ;;  %v90_v35 = vpack.c.bf16 %v37_v32, %v33_v30  ;;  %v42_v36 = vld [vmem:[%s625_s1 + $0xc8] sm:$0xff]  ;;  %v44_v38 = vld [vmem:[%s625_s1 + $0xd8] sm:$0xff]  ;;  %v92_v39 = vpack.c.bf16 %v39_v34, %v35_v33  ;;  %v41_v42 = vld [vmem:[%s625_s1 + $0xc0] sm:$0xff] }
   0xa   :  { %139 = vmatpush1.bf16.msra.mxu0 %v86_v22  ;;  %v46_v37 = vld [vmem:[%s625_s1 + $0xe8] sm:$0xff]  ;;  %v48_v41 = vld [vmem:[%s625_s1 + $0xf8] sm:$0xff]  ;;  %v45_v43 = vld [vmem:[%s625_s1 + $0xe0] sm:$0xff] }
   0xb   :  { %182 = vmatpush1.bf16.msra.mxu1 %v88_v26  ;;  %140 = vmatprep.subr.bf16.mxu0 %v91_v27  ;;  %v95_v40 = vpack.c.bf16 %v46_v37, %v42_v36  ;;  %v97_v44 = vpack.c.bf16 %v48_v41, %v44_v38  ;;  %v43_v45 = vld [vmem:[%s625_s1 + $0xd0] sm:$0xff]  ;;  %v50_v47 = vld [vmem:[%s625_s1 + $0x108] sm:$0xff]  ;;  %v52_v49 = vld [vmem:[%s625_s1 + $0x118] sm:$0xff]  ;;  %v94_v51 = vpack.c.bf16 %v45_v43, %v41_v42  ;;  %v116_v36 = vlaneseq }
   0xc   :  { %183 = vmatprep.subr.bf16.mxu1 %v93_v31  ;;  %v47_v46 = vld [vmem:[%s625_s1 + $0xf0] sm:$0xff]  ;;  %v54_v48 = vld [vmem:[%s625_s1 + $0x128] sm:$0xff]  ;;  %v56_v50 = vld [vmem:[%s625_s1 + $0x138] sm:$0xff] }
   0xd   :  { %v96_v52 = vpack.c.bf16 %v47_v46, %v43_v45  ;;  %v99_v53 = vpack.c.bf16 %v54_v48, %v50_v47  ;;  %v49_v54 = vld [vmem:[%s625_s1 + $0x100] sm:$0xff]  ;;  %v51_v56 = vld [vmem:[%s625_s1 + $0x110] sm:$0xff]  ;;  %v101_v57 = vpack.c.bf16 %v56_v50, %v52_v49  ;;  %v58_v59 = vld [vmem:[%s625_s1 + $0x148] sm:$0xff]  ;;  %v117_v37 = vshrl.u32 %v116_v36, 7 }
   0xe   :  { %141 = vmatpush1.bf16.msra.mxu0 %v90_v35  ;;  %v53_v55 = vld [vmem:[%s625_s1 + $0x120] sm:$0xff]  ;;  %v55_v58 = vld [vmem:[%s625_s1 + $0x130] sm:$0xff]  ;;  %v62_v60 = vld [vmem:[%s625_s1 + $0x168] sm:$0xff] }
   0xf   :  { %184 = vmatpush1.bf16.msra.mxu1 %v92_v39  ;;  %142 = vmatprep.subr.bf16.mxu0 %v95_v40  ;;  %v60_v61 = vld [vmem:[%s625_s1 + $0x158] sm:$0xff]  ;;  %v98_v63 = vpack.c.bf16 %v53_v55, %v49_v54  ;;  %v100_v0 = vpack.c.bf16 %v55_v58, %v51_v56  ;;  %v103_v1 = vpack.c.bf16 %v62_v60, %v58_v59  ;;  %v57_v2 = vld [vmem:[%s625_s1 + $0x140] sm:$0xff]  ;;  %v59_v4 = vld [vmem:[%s625_s1 + $0x150] sm:$0xff]  ;;  %v118_v38 = vsub.s32 0, %v117_v37 }
  0x10   :  { %185 = vmatprep.subr.bf16.mxu1 %v97_v44  ;;  %v64_v62 = vld [vmem:[%s625_s1 + $0x178] sm:$0xff]  ;;  %v61_v3 = vld [vmem:[%s625_s1 + $0x160] sm:$0xff]  ;;  %v63_v6 = vld [vmem:[%s625_s1 + $0x170] sm:$0xff]  ;;  %v126_v40 = vsub.s32 2, %v117_v37  ;;  %v122_v41 = vsub.s32 1, %v117_v37  ;;  %v130_v42 = vsub.s32 3, %v117_v37 }
  0x11   :  { %v105_v5 = vpack.c.bf16 %v64_v62, %v60_v61  ;;  %v66_v7 = vld [vmem:[%s625_s1 + $0x188] sm:$0xff]  ;;  %v68_v9 = vld [vmem:[%s625_s1 + $0x198] sm:$0xff]  ;;  %v102_v11 = vpack.c.bf16 %v61_v3, %v57_v2  ;;  %v104_v12 = vpack.c.bf16 %v63_v6, %v59_v4  ;;  %v65_v14 = vld [vmem:[%s625_s1 + $0x180] sm:$0xff] }
  0x12   :  { %143 = vmatpush1.bf16.msra.mxu0 %v94_v51  ;;  %v70_v8 = vld [vmem:[%s625_s1 + $0x1a8] sm:$0xff]  ;;  %v72_v10 = vld [vmem:[%s625_s1 + $0x1b8] sm:$0xff]  ;;  %v69_v15 = vld [vmem:[%s625_s1 + $0x1a0] sm:$0xff] }
  0x13   :  { %186 = vmatpush1.bf16.msra.mxu1 %v96_v52  ;;  %144 = vmatprep.subr.bf16.mxu0 %v99_v53  ;;  %v107_v13 = vpack.c.bf16 %v70_v8, %v66_v7  ;;  %v67_v16 = vld [vmem:[%s625_s1 + $0x190] sm:$0xff]  ;;  %v109_v17 = vpack.c.bf16 %v72_v10, %v68_v9  ;;  %v74_v19 = vld [vmem:[%s625_s1 + $0x1c8] sm:$0xff]  ;;  %v76_v21 = vld [vmem:[%s625_s1 + $0x1d8] sm:$0xff]  ;;  %v106_v23 = vpack.c.bf16 %v69_v15, %v65_v14 }
  0x14   :  { %187 = vmatprep.subr.bf16.mxu1 %v101_v57  ;;  %v71_v18 = vld [vmem:[%s625_s1 + $0x1b0] sm:$0xff]  ;;  %v78_v20 = vld [vmem:[%s625_s1 + $0x1e8] sm:$0xff]  ;;  %v80_v22 = vld [vmem:[%s625_s1 + $0x1f8] sm:$0xff] }
  0x15   :  { %v108_v24 = vpack.c.bf16 %v71_v18, %v67_v16  ;;  %v111_v25 = vpack.c.bf16 %v78_v20, %v74_v19  ;;  %v73_v26 = vld [vmem:[%s625_s1 + $0x1c0] sm:$0xff]  ;;  %v113_v28 = vpack.c.bf16 %v80_v22, %v76_v21  ;;  %v75_v29 = vld [vmem:[%s625_s1 + $0x1d0] sm:$0xff]  ;;  %v16_v33 = vld [vmem:[%s626_s0 + $0x8] sm:$0xff] }
  0x16   :  { %145 = vmatpush1.bf16.msra.mxu0 %v98_v63  ;;  %v77_v27 = vld [vmem:[%s625_s1 + $0x1e0] sm:$0xff]  ;;  %v79_v30 = vld [vmem:[%s625_s1 + $0x1f0] sm:$0xff] }
  0x17   :  { %188 = vmatpush1.bf16.msra.mxu1 %v100_v0  ;;  %146 = vmatprep.subr.bf16.mxu0 %v103_v1  ;;  %v110_v31 = vpack.c.bf16 %v77_v27, %v73_v26  ;;  %v15_v32 = vld [vmem:[%s626_s0] sm:$0xff]  ;;  %v112_v34 = vpack.c.bf16 %v79_v30, %v75_v29 }
  0x18   :  { %189 = vmatprep.subr.bf16.mxu1 %v105_v5  ;;  %v81_v35 = vpack.c.bf16 %v16_v33, %v15_v32  ;;  %v114_v39 = vld [vmem:[%s627_s2] sm:$0xf] }
  0x19   :  { %v119_v43 = vrot.slane %v114_v39, %v118_v38  ;;  %v127_v44 = vrot.slane %v114_v39, %v126_v40  ;;  %v123_v45 = vrot.slane %v114_v39, %v122_v41  ;;  %v131_v46 = vrot.slane %v114_v39, %v130_v42 }
  0x1a   :  { %147 = vmatpush1.bf16.msra.mxu0 %v102_v11 }
  0x1b   :  { %190 = vmatpush1.bf16.msra.mxu1 %v104_v12  ;;  %148 = vmatprep.subr.bf16.mxu0 %v107_v13 }
  0x1c   :  { %191 = vmatprep.subr.bf16.mxu1 %v109_v17 }
  0x1e   :  { %149 = vmatpush1.bf16.msra.mxu0 %v106_v23 }
  0x1f   :  { %192 = vmatpush1.bf16.msra.mxu1 %v108_v24  ;;  %150 = vmatprep.subr.bf16.mxu0 %v111_v25 }
  0x20   :  { %193 = vmatprep.subr.bf16.mxu1 %v113_v28 }
  0x22   :  { %151 = vmatpush1.bf16.msra.mxu0 %v110_v31 }
  0x23   :  { %194 = vmatpush1.bf16.msra.mxu1 %v112_v34 }
  0x25   :  { %169 = vmatmul.mubr.bf16.vlgmr.msra.gmra.mrb[0].mxu0 %v81_v35 }
  0x26   :  { %212 = vmatmul.mubr.bf16.vlgmr.msra.gmra.mrb[0].mxu1 %v81_v35 }
  0xf8   :  { %v170_v47 = vpop.f32.mrb[0].mxu0 }
  0xf9   :  { %v545_v48 = vadd.f32 %v170_v47, %v119_v43  ;;  %v213_v49 = vpop.f32.mrb[0].mxu1  ;;  %v172_v50 = vpop.f32.mrb[1].mxu0 }
  0xfa   :  { %v547_v51 = vadd.f32 %v213_v49, %v127_v44  ;;  %v549_v52 = vadd.f32 %v172_v50, %v123_v45  ;;  %v215_v53 = vpop.f32.mrb[1].mxu1  ;;  %v174_v54 = vpop.f32.mrb[2].mxu0 }
  0xfb   :  { %v222_v55 = vmul.f32 %v545_v48, %v545_v48  ;;  %v553_v56 = vadd.f32 %v215_v53, %v131_v46  ;;  %v555_v57 = vadd.f32 %v174_v54, %v119_v43  ;;  %v217_v58 = vpop.f32.mrb[2].mxu1  ;;  %v176_v59 = vpop.f32.mrb[3].mxu0 }
  0xfc   :  { %v224_v60 = vmul.f32 %v547_v51, %v547_v51  ;;  %v223_v61 = vmul.f32 %v549_v52, %v549_v52  ;;  %v561_v62 = vadd.f32 %v217_v58, %v127_v44  ;;  %v563_v63 = vadd.f32 %v176_v59, %v123_v45  ;;  %v219_v0 = vpop.f32.mrb[3].mxu1 }
  0xfd   :  { %v230_v1 = vmul.f32 %v222_v55, %v545_v48  ;;  %v225_v2 = vmul.f32 %v553_v56, %v553_v56  ;;  %v226_v3 = vmul.f32 %v555_v57, %v555_v57  ;;  %v570_v4 = vadd.f32 %v219_v0, %v131_v46 }
  0xfe   :  { %v232_v5 = vmul.f32 %v224_v60, %v547_v51  ;;  %v231_v6 = vmul.f32 %v223_v61, %v549_v52  ;;  %v228_v7 = vmul.f32 %v561_v62, %v561_v62  ;;  %v227_v8 = vmul.f32 %v563_v63, %v563_v63 }
  0xff   :  { %v238_v9 = vmul.f32 0.044715, %v230_v1  ;;  %v233_v10 = vmul.f32 %v225_v2, %v553_v56  ;;  %v234_v11 = vmul.f32 %v226_v3, %v555_v57  ;;  %v229_v12 = vmul.f32 %v570_v4, %v570_v4 }
 0x100   :  { %v240_v13 = vmul.f32 0.044715, %v232_v5  ;;  %v239_v14 = vmul.f32 0.044715, %v231_v6  ;;  %v236_v15 = vmul.f32 %v228_v7, %v561_v62  ;;  %v235_v16 = vmul.f32 %v227_v8, %v563_v63 }
 0x101   :  { %v246_v17 = vadd.f32 %v238_v9, %v545_v48  ;;  %v241_v18 = vmul.f32 0.044715, %v233_v10  ;;  %v242_v19 = vmul.f32 0.044715, %v234_v11  ;;  %v237_v20 = vmul.f32 %v229_v12, %v570_v4 }
 0x102   :  { %v248_v21 = vadd.f32 %v240_v13, %v547_v51  ;;  %v247_v22 = vadd.f32 %v239_v14, %v549_v52  ;;  %v244_v23 = vmul.f32 0.044715, %v236_v15  ;;  %v243_v24 = vmul.f32 0.044715, %v235_v16 }
 0x103   :  { %v254_v25 = vmul.f32 0.7978846, %v246_v17  ;;  %v249_v26 = vadd.f32 %v241_v18, %v553_v56  ;;  %v250_v27 = vadd.f32 %v242_v19, %v555_v57  ;;  %v245_v28 = vmul.f32 0.044715, %v237_v20 }
 0x104   :  { %v256_v29 = vmul.f32 0.7978846, %v248_v21  ;;  %v255_v30 = vmul.f32 0.7978846, %v247_v22  ;;  %v252_v31 = vadd.f32 %v244_v23, %v561_v62  ;;  %v251_v32 = vadd.f32 %v243_v24, %v563_v63 }
 0x105   :  { %307 = vtanh.f32 %v254_v25  ;;  %v257_v33 = vmul.f32 0.7978846, %v249_v26  ;;  %v258_v34 = vmul.f32 0.7978846, %v250_v27  ;;  %v253_v35 = vadd.f32 %v245_v28, %v570_v4 }
 0x106   :  { %309 = vtanh.f32 %v256_v29  ;;  %v260_v36 = vmul.f32 0.7978846, %v252_v31  ;;  %v259_v37 = vmul.f32 0.7978846, %v251_v32 }
 0x107   :  { %311 = vtanh.f32 %v255_v30  ;;  %v261_v38 = vmul.f32 0.7978846, %v253_v35 }
 0x108   :  { %313 = vtanh.f32 %v257_v33 }
 0x109   :  { %315 = vtanh.f32 %v258_v34 }
 0x10a   :  { %317 = vtanh.f32 %v260_v36 }
 0x10b   :  { %319 = vtanh.f32 %v259_v37 }
 0x10c   :  { %321 = vtanh.f32 %v261_v38 }
 0x10f   :  { %v308_v39 = vpop.eup %307 }
 0x110   :  { %v310_v40 = vpop.eup %309  ;;  %v270_v41 = vadd.f32 1.0, %v308_v39 }
 0x111   :  { %v312_v42 = vpop.eup %311  ;;  %v272_v43 = vadd.f32 1.0, %v310_v40 }
 0x112   :  { %v314_v44 = vpop.eup %313  ;;  %v278_v45 = vmul.f32 0.5, %v270_v41  ;;  %v271_v46 = vadd.f32 1.0, %v312_v42 }
 0x113   :  { %v316_v47 = vpop.eup %315  ;;  %v280_v49 = vmul.f32 0.5, %v272_v43  ;;  %v273_v50 = vadd.f32 1.0, %v314_v44 }
 0x114   :  { %v318_v53 = vpop.eup %317  ;;  %v286_v54 = vmul.f32 %v278_v45, %v545_v48  ;;  %v279_v55 = vmul.f32 0.5, %v271_v46  ;;  %v274_v58 = vadd.f32 1.0, %v316_v47 }
 0x115   :  { %v320_v59 = vpop.eup %319  ;;  %v288_v60 = vmul.f32 %v280_v49, %v547_v51  ;;  %v281_v61 = vmul.f32 0.5, %v273_v50  ;;  %v276_v0 = vadd.f32 1.0, %v318_v53 }
 0x116   :  { %v322_v1 = vpop.eup %321  ;;  %294 = vst [vmem:[%s628_s3] sm:$0xff] %v286_v54  ;;  %v287_v2 = vmul.f32 %v279_v55, %v549_v52  ;;  %v282_v3 = vmul.f32 0.5, %v274_v58  ;;  %v275_v5 = vadd.f32 1.0, %v320_v59 }
 0x117   :  { %296 = vst [vmem:[%s628_s3 + $0x10] sm:$0xff] %v288_v60  ;;  %v289_v48 = vmul.f32 %v281_v61, %v553_v56  ;;  %v284_v6 = vmul.f32 0.5, %v276_v0  ;;  %v277_v7 = vadd.f32 1.0, %v322_v1 }
 0x118   :  { %295 = vst [vmem:[%s628_s3 + $0x8] sm:$0xff] %v287_v2  ;;  %v290_v51 = vmul.f32 %v282_v3, %v555_v57  ;;  %v283_v8 = vmul.f32 0.5, %v275_v5 }
 0x119   :  { %297 = vst [vmem:[%s628_s3 + $0x18] sm:$0xff] %v289_v48  ;;  %v292_v52 = vmul.f32 %v284_v6, %v561_v62  ;;  %v285_v9 = vmul.f32 0.5, %v277_v7 }
 0x11a   :  { %298 = vst [vmem:[%s628_s3 + $0x20] sm:$0xff] %v290_v51  ;;  %v291_v56 = vmul.f32 %v283_v8, %v563_v63 }
 0x11b   :  { %300 = vst [vmem:[%s628_s3 + $0x30] sm:$0xff] %v292_v52  ;;  %v293_v57 = vmul.f32 %v285_v9, %v570_v4 }
 0x11c   :  { %299 = vst [vmem:[%s628_s3 + $0x28] sm:$0xff] %v291_v56 }
 0x11d   :  { %301 = vst [vmem:[%s628_s3 + $0x38] sm:$0xff] %v293_v57 }

</bundles_post_ra>
